<compile_context>
chip_gen: v7x
topology: tpu7x:2x2x1
jax: 0.10.0
libtpu: 0.0.40
codegen_flags: <defaults>
</compile_context>

<pallas_src>
import functools

import jax
import jax.numpy as jnp
from jax import lax
from jax.experimental import pallas as pl
from jax.experimental.pallas import tpu as pltpu


_LN_EPS = 1e-6                  # timm ViT LayerNorm eps
_INV_SQRT2 = 0.7071067811865476

_VMEM_LIMIT_CACHE = None


def _vmem_limit_bytes():
  """Generation-aware VMEM scope limit (3/4 of physical, conservative fallback)."""
  global _VMEM_LIMIT_CACHE
  if _VMEM_LIMIT_CACHE is None:
    try:
      cap = int(pltpu.get_tpu_info().vmem_capacity_bytes)
    except Exception:
      cap = 64 * 1024 * 1024            # v7x-safe fallback
    _VMEM_LIMIT_CACHE = max(32 * 1024 * 1024,
                            min((cap * 3) // 4, 112 * 1024 * 1024))
  return _VMEM_LIMIT_CACHE


def _cparams(n_grid_axes):
  return pltpu.CompilerParams(
      dimension_semantics=("parallel",) * n_grid_axes,
      vmem_limit_bytes=_vmem_limit_bytes(),
  )


def _batch_tile(batch, tokens_pad, target_rows=512):
  """Largest divisor of `batch` so that bt*tokens_pad stays near target_rows."""
  bt_max = max(1, target_rows // max(tokens_pad, 1))
  best = 1
  for d in range(1, batch + 1):
    if batch % d == 0 and d <= bt_max:
      best = d
  return best


def _layernorm_f32(x, gamma, beta, eps):
  mu = jnp.mean(x, axis=-1, keepdims=True)
  xc = x - mu
  var = jnp.mean(xc * xc, axis=-1, keepdims=True)
  return xc * lax.rsqrt(var + eps) * gamma + beta


# ----------------------------------------------------------------------------
# Kernel 1: patch embedding + cls/pos/pad assembly (conv 16x16/s16 as matmul)
# ----------------------------------------------------------------------------

def _embed_kernel(p_ref, w_ref, base_ref, o_ref):
  # p_ref   : [Bt, Tp, Cpp] bf16  (row 0 and pad rows are zero)
  # w_ref   : [Cpp, D]      bf16  (/255 folded in)
  # base_ref: [1, Tp, D]    f32   (cls@row0 + pos + patch bias, zeros at pad)
  bt, tp, cpp = p_ref.shape
  d = w_ref.shape[1]
  pf = p_ref[...].reshape(bt * tp, cpp)                       # Tp % 8 == 0
  emb = jnp.dot(pf, w_ref[...], preferred_element_type=jnp.float32)
  emb = emb.reshape(bt, tp, d) + base_ref[...]
  o_ref[...] = emb.astype(o_ref.dtype)


def patch_embed(patches_pad, patch_w, base, *, bt):
  B, Tp, Cpp = patches_pad.shape
  D = patch_w.shape[1]
  return pl.pallas_call(
      _embed_kernel,
      out_shape=jax.ShapeDtypeStruct((B, Tp, D), jnp.bfloat16),
      grid=(B // bt,),
      in_specs=[
          pl.BlockSpec((bt, Tp, Cpp), lambda i: (i, 0, 0)),
          pl.BlockSpec((Cpp, D), lambda i: (0, 0)),
          pl.BlockSpec((1, Tp, D), lambda i: (0, 0, 0)),
      ],
      out_specs=pl.BlockSpec((bt, Tp, D), lambda i: (i, 0, 0)),
      compiler_params=_cparams(1),
  )(patches_pad, patch_w, base)


# ----------------------------------------------------------------------------
# Kernel 2: one fused transformer block
#   out = h + FC2(GELU(FC1(LN2(h))))   where   h = x + Proj(MHSA(LN1(x)))
# ----------------------------------------------------------------------------

def _block_kernel(x_ref, ln1_g_ref, ln1_b_ref, qkv_w_ref, qkv_b_ref,
                  proj_w_ref, proj_b_ref, ln2_g_ref, ln2_b_ref,
                  fc1_w_ref, fc1_b_ref, fc2_w_ref, fc2_b_ref, o_ref,
                  *, num_heads, head_dim, scale, t_real, eps):
  bt, tp, d = x_ref.shape
  m = bt * tp

  x_bf = x_ref[...].reshape(m, d)                             # bf16 [M, D]

  # ---- LN1 -> QKV (M-rows matmul, f32 accumulate, single bf16 cast) ----
  hn = _layernorm_f32(x_bf.astype(jnp.float32), ln1_g_ref[...],
                      ln1_b_ref[...], eps).astype(jnp.bfloat16)
  qkv = jnp.dot(hn, qkv_w_ref[...], preferred_element_type=jnp.float32)
  qkv = (qkv + qkv_b_ref[...].astype(jnp.float32)).astype(jnp.bfloat16)
  qkv = qkv.reshape(bt, tp, 3 * d)                            # Tp % 8 == 0

  need_mask = t_real < tp
  if need_mask:
    key_mask = lax.broadcasted_iota(jnp.int32, (bt, tp, tp), 2) < t_real

  # ---- per-head attention; output projection accumulated per head ----
  # (no head concat / no 32-lane-stride shuffled stores; proj_w row slices
  #  are sublane-aligned)
  acc = jnp.zeros((m, d), jnp.float32)
  for h in range(num_heads):
    lo = h * head_dim
    qh = qkv[:, :, lo:lo + head_dim]
    kh = qkv[:, :, d + lo:d + lo + head_dim]
    vh = qkv[:, :, 2 * d + lo:2 * d + lo + head_dim]
    s = jnp.einsum("bqd,bkd->bqk", qh, kh,
                   preferred_element_type=jnp.float32) * scale
    if need_mask:
      s = jnp.where(key_mask, s, -1e30)                       # ignore pad keys
    mmax = jnp.max(s, axis=-1, keepdims=True)
    p = jnp.exp(s - mmax)
    p = p * pl.reciprocal(jnp.sum(p, axis=-1, keepdims=True), approx=True)
    oh = jnp.einsum("bqk,bkd->bqd", p.astype(jnp.bfloat16), vh,
                    preferred_element_type=jnp.float32)       # [Bt, Tp, hd]
    acc = acc + jnp.dot(oh.reshape(m, head_dim).astype(jnp.bfloat16),
                        proj_w_ref[lo:lo + head_dim, :],
                        preferred_element_type=jnp.float32)

  # residual 1 (re-reads the bf16 block input; no long-lived f32 copy)
  h1 = x_bf.astype(jnp.float32) + acc + proj_b_ref[...].astype(jnp.float32)

  # ---- LN2 -> FC1 -> GELU(exact, matches torch.nn.GELU) -> FC2 -> residual ----
  hn2 = _layernorm_f32(h1, ln2_g_ref[...], ln2_b_ref[...], eps).astype(jnp.bfloat16)
  f1 = jnp.dot(hn2, fc1_w_ref[...], preferred_element_type=jnp.float32)
  f1 = f1 + fc1_b_ref[...].astype(jnp.float32)
  f1 = (0.5 * f1 * (1.0 + lax.erf(f1 * _INV_SQRT2))).astype(jnp.bfloat16)
  f2 = jnp.dot(f1, fc2_w_ref[...], preferred_element_type=jnp.float32)
  f2 = f2 + fc2_b_ref[...].astype(jnp.float32)

  o_ref[...] = (h1 + f2).reshape(bt, tp, d).astype(o_ref.dtype)


def transformer_block(x, blk, *, num_heads, head_dim, t_real, bt, eps=_LN_EPS):
  B, Tp, D = x.shape
  H = blk["fc1_w"].shape[1]
  kern = functools.partial(
      _block_kernel, num_heads=num_heads, head_dim=head_dim,
      scale=1.0 / (head_dim ** 0.5), t_real=t_real, eps=float(eps))
  return pl.pallas_call(
      kern,
      out_shape=jax.ShapeDtypeStruct((B, Tp, D), jnp.bfloat16),
      grid=(B // bt,),
      in_specs=[
          pl.BlockSpec((bt, Tp, D), lambda i: (i, 0, 0)),     # x
          pl.BlockSpec((1, D), lambda i: (0, 0)),             # ln1 gamma
          pl.BlockSpec((1, D), lambda i: (0, 0)),             # ln1 beta
          pl.BlockSpec((D, 3 * D), lambda i: (0, 0)),         # qkv_w
          pl.BlockSpec((1, 3 * D), lambda i: (0, 0)),         # qkv_b
          pl.BlockSpec((D, D), lambda i: (0, 0)),             # proj_w
          pl.BlockSpec((1, D), lambda i: (0, 0)),             # proj_b
          pl.BlockSpec((1, D), lambda i: (0, 0)),             # ln2 gamma
          pl.BlockSpec((1, D), lambda i: (0, 0)),             # ln2 beta
          pl.BlockSpec((D, H), lambda i: (0, 0)),             # fc1_w
          pl.BlockSpec((1, H), lambda i: (0, 0)),             # fc1_b
          pl.BlockSpec((H, D), lambda i: (0, 0)),             # fc2_w
          pl.BlockSpec((1, D), lambda i: (0, 0)),             # fc2_b
      ],
      out_specs=pl.BlockSpec((bt, Tp, D), lambda i: (i, 0, 0)),
      compiler_params=_cparams(1),
  )(x, blk["ln1_g"], blk["ln1_b"], blk["qkv_w"], blk["qkv_b"],
    blk["proj_w"], blk["proj_b"], blk["ln2_g"], blk["ln2_b"],
    blk["fc1_w"], blk["fc1_b"], blk["fc2_w"], blk["fc2_b"])


# ----------------------------------------------------------------------------
# Mini SPA-ViT (vit_base_patch16 analog, scaled-down dims) built on the kernels
# ----------------------------------------------------------------------------

class SPAEncoderPallas:
  # Real 'vit_base' has embed_dim=768, depth=12, heads=12; we use a small but
  # structurally identical config for the synthetic run.
  def __init__(self, *, img_size=32, patch_size=16, in_chans=3,
               embed_dim=128, depth=2, num_heads=4, mlp_ratio=4):
    self.patch = patch_size
    self.in_chans = in_chans
    self.dim = embed_dim
    self.depth = depth
    self.heads = num_heads
    self.head_dim = embed_dim // num_heads
    self.num_patches = (img_size // patch_size) ** 2
    self.tokens = self.num_patches + 1                        # + cls token
    self.tokens_pad = ((self.tokens + 7) // 8) * 8            # sublane-aligned
    self.mlp_hidden = embed_dim * mlp_ratio
    self.feature_dim = embed_dim                              # {'vit_base': 768}
    self.params = self._init_params(jax.random.PRNGKey(42))

  def _init_params(self, key):
    D, H, T, Tp = self.dim, self.mlp_hidden, self.tokens, self.tokens_pad
    patch_in = self.in_chans * self.patch * self.patch
    ks = iter(jax.random.split(key, 4 + 4 * self.depth))

    def nrm(shape, dtype=jnp.bfloat16):
      return (0.02 * jax.random.normal(next(ks), shape, jnp.float32)).astype(dtype)

    # conv16x16/s16 as matmul; SPAEncoder's /255 folded into the weights
    # (bias is NOT scaled: conv(x/255) = x @ (W/255) + b).
    patch_w = 0.02 * jax.random.normal(next(ks), (patch_in, D), jnp.float32)
    patch_w = (patch_w / 255.0).astype(jnp.bfloat16)
    patch_b = jnp.zeros((1, D), jnp.float32)

    cls = 0.02 * jax.random.normal(next(ks), (1, 1, D), jnp.float32)
    pos = 0.02 * jax.random.normal(next(ks), (1, T, D), jnp.float32)

    # "base" slab folded into the patch-embed epilogue:
    #   row 0        = cls + pos[0]
    #   rows 1..T-1  = pos[row] + patch bias
    #   rows T..Tp-1 = 0  (padding)
    base = jnp.zeros((1, Tp, D), jnp.float32)
    base = base.at[:, :T, :].set(pos)
    base = base.at[:, 0, :].add(cls[:, 0, :])
    base = base.at[:, 1:T, :].add(patch_b)

    p = {
        "patch_w": patch_w,
        "base": base,
        "ln_f_g": jnp.ones((1, D), jnp.float32),
        "ln_f_b": jnp.zeros((1, D), jnp.float32),
        "blocks": [],
    }
    for _ in range(self.depth):
      p["blocks"].append({
          "ln1_g": jnp.ones((1, D), jnp.float32),
          "ln1_b": jnp.zeros((1, D), jnp.float32),
          "qkv_w": nrm((D, 3 * D)),
          "qkv_b": jnp.zeros((1, 3 * D), jnp.float32),
          "proj_w": nrm((D, D)),
          "proj_b": jnp.zeros((1, D), jnp.float32),
          "ln2_g": jnp.ones((1, D), jnp.float32),
          "ln2_b": jnp.zeros((1, D), jnp.float32),
          "fc1_w": nrm((D, H)),
          "fc1_b": jnp.zeros((1, H), jnp.float32),
          "fc2_w": nrm((H, D)),
          "fc2_b": jnp.zeros((1, D), jnp.float32),
      })
    return p

  def _patchify_padded(self, x):
    # x: [B, C, H, W] (NCHW like PyTorch) -> [B, Tp, C*ph*pw] bf16 with a zero
    # row at token 0 (cls slot) and zero rows at the sublane padding.
    B, C, Himg, Wimg = x.shape
    ph = pw = self.patch
    gh, gw = Himg // ph, Wimg // pw
    xp = x.reshape(B, C, gh, ph, gw, pw)
    xp = jnp.transpose(xp, (0, 2, 4, 1, 3, 5)).reshape(B, gh * gw, C * ph * pw)
    xp = jnp.pad(xp, ((0, 0), (1, self.tokens_pad - self.tokens), (0, 0)))
    return xp.astype(jnp.bfloat16)

  def __call__(self, x):
    p = self.params
    B = x.shape[0]
    Tp = self.tokens_pad
    bt = _batch_tile(B, Tp)

    # --- patch embedding + cls/pos/pad assembly (one fused kernel) ---
    patches = self._patchify_padded(x)                        # [B, Tp, Cpp]
    h = patch_embed(patches, p["patch_w"], p["base"], bt=bt)  # [B, Tp, D] bf16

    # --- transformer blocks: ONE fused pallas_call per block ---
    for blk in p["blocks"]:
      h = transformer_block(h, blk, num_heads=self.heads,
                            head_dim=self.head_dim,
                            t_real=self.tokens, bt=bt)

    # --- final LayerNorm on the cls row only (per-token op => equivalent);
    #     done in plain XLA: the work is [B, D], far below kernel-launch cost.
    # TODO(synk): SPA's exact readout (cls vs. mean-pooled patch tokens) depends
    # on spa.models internals; we return the cls-token feature [B, feature_dim].
    cls_feat = h[:, 0, :].astype(jnp.float32)
    mu = jnp.mean(cls_feat, axis=-1, keepdims=True)
    xc = cls_feat - mu
    var = jnp.mean(xc * xc, axis=-1, keepdims=True)
    return xc * lax.rsqrt(var + _LN_EPS) * p["ln_f_g"] + p["ln_f_b"]


# ----------------------------------------------------------------------------

if __name__ == "__main__":
  key = jax.random.PRNGKey(0)
  # Image-like uint8-range input (the module divides by 255), NCHW, small size.
  x = jax.random.uniform(key, (2, 3, 32, 32), jnp.float32, 0.0, 255.0)

  enc = SPAEncoderPallas(img_size=32, patch_size=16, in_chans=3,
                         embed_dim=128, depth=2, num_heads=4, mlp_ratio=4)
  feats = jax.jit(enc.__call__)(x)
  feats = jax.block_until_ready(feats)
  assert feats.shape == (2, enc.feature_dim)
  assert bool(jnp.all(jnp.isfinite(feats)))
  print("KERNEL_OK")
</pallas_src>

<mosaic_0001>
module attributes {stable_mosaic.version = 11 : i64} {
  func.func @_embed_kernel(%arg0: i32, %arg1: memref<2x8x768xbf16, #tpu.memory_space<vmem>>, %arg2: memref<768x128xbf16, #tpu.memory_space<vmem>>, %arg3: memref<1x8x128xf32, #tpu.memory_space<vmem>>, %arg4: memref<2x8x128xbf16, #tpu.memory_space<vmem>>) attributes {dimension_semantics = [#tpu.dimension_semantics<parallel>], iteration_bounds = array<i64: 1>, scalar_prefetch = 0 : i64, scratch_operands = 0 : i64, tpu.core_type = #tpu.core_type<tc>, window_params = [{transform_indices = @transform_0, window_bounds = array<i64: 2, 8, 768>}, {pipeline_mode = #tpu.pipeline_mode<synchronous>, transform_indices = @transform_1, window_bounds = array<i64: 768, 128>}, {pipeline_mode = #tpu.pipeline_mode<synchronous>, transform_indices = @transform_2, window_bounds = array<i64: 1, 8, 128>}, {transform_indices = @transform_3, window_bounds = array<i64: 2, 8, 128>}]} {
    %c0 = arith.constant 0 : index
    %c0_0 = arith.constant 0 : index
    %c0_1 = arith.constant 0 : index
    %0 = vector.load %arg1[%c0, %c0_0, %c0_1] : memref<2x8x768xbf16, #tpu.memory_space<vmem>>, vector<2x8x768xbf16>
    %1 = vector.shape_cast %0 : vector<2x8x768xbf16> to vector<16x768xbf16>
    %c0_2 = arith.constant 0 : index
    %c0_3 = arith.constant 0 : index
    %2 = vector.load %arg2[%c0_2, %c0_3] : memref<768x128xbf16, #tpu.memory_space<vmem>>, vector<768x128xbf16>
    %cst = arith.constant dense<0.000000e+00> : vector<16x128xf32>
    %3 = tpu.matmul %1, %2, %cst {dimension_numbers = #tpu.dot_dimension_numbers<[1], [0], [0], [1], [0, 0, 1, 1], [], []>} : vector<16x768xbf16>, vector<768x128xbf16>, vector<16x128xf32> -> vector<16x128xf32>
    %4 = vector.shape_cast %3 : vector<16x128xf32> to vector<2x8x128xf32>
    %c0_4 = arith.constant 0 : index
    %c0_5 = arith.constant 0 : index
    %c0_6 = arith.constant 0 : index
    %5 = vector.load %arg3[%c0_4, %c0_5, %c0_6] : memref<1x8x128xf32, #tpu.memory_space<vmem>>, vector<1x8x128xf32>
    %6 = vector.broadcast %5 : vector<1x8x128xf32> to vector<2x8x128xf32>
    %7 = arith.addf %4, %6 : vector<2x8x128xf32>
    %8 = arith.truncf %7 : vector<2x8x128xf32> to vector<2x8x128xbf16>
    %c0_7 = arith.constant 0 : index
    %c0_8 = arith.constant 0 : index
    %c0_9 = arith.constant 0 : index
    %9 = vector.load %arg4[%c0_7, %c0_8, %c0_9] : memref<2x8x128xbf16, #tpu.memory_space<vmem>>, vector<2x8x128xbf16>
    tpu.vector_store %arg4[%c0_7, %c0_8, %c0_9], %8 {strides = array<i32>} : memref<2x8x128xbf16, #tpu.memory_space<vmem>>, vector<2x8x128xbf16>,
    return
  }
  func.func @transform_0(%arg0: i32) -> (i32, i32, i32) {
    %c0_i32 = arith.constant 0 : i32
    %c0_i32_0 = arith.constant 0 : i32
    %c0_i32_1 = arith.constant 0 : i32
    return %arg0, %c0_i32, %c0_i32_0 : i32, i32, i32
  }
  func.func @transform_1(%arg0: i32) -> (i32, i32) {
    %c0_i32 = arith.constant 0 : i32
    %c0_i32_0 = arith.constant 0 : i32
    %c0_i32_1 = arith.constant 0 : i32
    return %c0_i32, %c0_i32_0 : i32, i32
  }
  func.func @transform_2(%arg0: i32) -> (i32, i32, i32) {
    %c0_i32 = arith.constant 0 : i32
    %c0_i32_0 = arith.constant 0 : i32
    %c0_i32_1 = arith.constant 0 : i32
    %c0_i32_2 = arith.constant 0 : i32
    return %c0_i32, %c0_i32_0, %c0_i32_1 : i32, i32, i32
  }
  func.func @transform_3(%arg0: i32) -> (i32, i32, i32) {
    %c0_i32 = arith.constant 0 : i32
    %c0_i32_0 = arith.constant 0 : i32
    %c0_i32_1 = arith.constant 0 : i32
    return %arg0, %c0_i32, %c0_i32_0 : i32, i32, i32
  }
}

module attributes {stable_mosaic.version = 11 : i64} {
  func.func @_block_kernel(%arg0: i32, %arg1: memref<2x8x128xbf16, #tpu.memory_space<vmem>>, %arg2: memref<1x128xf32, #tpu.memory_space<vmem>>, %arg3: memref<1x128xf32, #tpu.memory_space<vmem>>, %arg4: memref<128x384xbf16, #tpu.memory_space<vmem>>, %arg5: memref<1x384xf32, #tpu.memory_space<vmem>>, %arg6: memref<128x128xbf16, #tpu.memory_space<vmem>>, %arg7: memref<1x128xf32, #tpu.memory_space<vmem>>, %arg8: memref<1x128xf32, #tpu.memory_space<vmem>>, %arg9: memref<1x128xf32, #tpu.memory_space<vmem>>, %arg10: memref<128x512xbf16, #tpu.memory_space<vmem>>, %arg11: memref<1x512xf32, #tpu.memory_space<vmem>>, %arg12: memref<512x128xbf16, #tpu.memory_space<vmem>>, %arg13: memref<1x128xf32, #tpu.memory_space<vmem>>, %arg14: memref<2x8x128xbf16, #tpu.memory_space<vmem>>) attributes {dimension_semantics = [#tpu.dimension_semantics<parallel>], iteration_bounds = array<i64: 1>, scalar_prefetch = 0 : i64, scratch_operands = 0 : i64, tpu.core_type = #tpu.core_type<tc>, window_params = [{transform_indices = @transform_0, window_bounds = array<i64: 2, 8, 128>}, {pipeline_mode = #tpu.pipeline_mode<synchronous>, transform_indices = @transform_1, window_bounds = array<i64: 1, 128>}, {pipeline_mode = #tpu.pipeline_mode<synchronous>, transform_indices = @transform_2, window_bounds = array<i64: 1, 128>}, {pipeline_mode = #tpu.pipeline_mode<synchronous>, transform_indices = @transform_3, window_bounds = array<i64: 128, 384>}, {pipeline_mode = #tpu.pipeline_mode<synchronous>, transform_indices = @transform_4, window_bounds = array<i64: 1, 384>}, {pipeline_mode = #tpu.pipeline_mode<synchronous>, transform_indices = @transform_5, window_bounds = array<i64: 128, 128>}, {pipeline_mode = #tpu.pipeline_mode<synchronous>, transform_indices = @transform_6, window_bounds = array<i64: 1, 128>}, {pipeline_mode = #tpu.pipeline_mode<synchronous>, transform_indices = @transform_7, window_bounds = array<i64: 1, 128>}, {pipeline_mode = #tpu.pipeline_mode<synchronous>, transform_indices = @transform_8, window_bounds = array<i64: 1, 128>}, {pipeline_mode = #tpu.pipeline_mode<synchronous>, transform_indices = @transform_9, window_bounds = array<i64: 128, 512>}, {pipeline_mode = #tpu.pipeline_mode<synchronous>, transform_indices = @transform_10, window_bounds = array<i64: 1, 512>}, {pipeline_mode = #tpu.pipeline_mode<synchronous>, transform_indices = @transform_11, window_bounds = array<i64: 512, 128>}, {pipeline_mode = #tpu.pipeline_mode<synchronous>, transform_indices = @transform_12, window_bounds = array<i64: 1, 128>}, {transform_indices = @transform_13, window_bounds = array<i64: 2, 8, 128>}]} {
    %c0 = arith.constant 0 : index
    %c0_0 = arith.constant 0 : index
    %c0_1 = arith.constant 0 : index
    %0 = vector.load %arg1[%c0, %c0_0, %c0_1] : memref<2x8x128xbf16, #tpu.memory_space<vmem>>, vector<2x8x128xbf16>
    %1 = vector.shape_cast %0 : vector<2x8x128xbf16> to vector<16x128xbf16>
    %2 = arith.extf %1 : vector<16x128xbf16> to vector<16x128xf32>
    %c0_2 = arith.constant 0 : index
    %c0_3 = arith.constant 0 : index
    %3 = vector.load %arg2[%c0_2, %c0_3] : memref<1x128xf32, #tpu.memory_space<vmem>>, vector<1x128xf32>
    %c0_4 = arith.constant 0 : index
    %c0_5 = arith.constant 0 : index
    %4 = vector.load %arg3[%c0_4, %c0_5] : memref<1x128xf32, #tpu.memory_space<vmem>>, vector<1x128xf32>
    %cst = arith.constant dense<0.000000e+00> : vector<16xf32>
    %5 = vector.multi_reduction <add>, %2, %cst [1] : vector<16x128xf32> to vector<16xf32>
    %6 = vector.shape_cast %5 : vector<16xf32> to vector<16x1xf32>
    %cst_6 = arith.constant 1.280000e+02 : f32
    %7 = vector.broadcast %cst_6 : f32 to vector<16x1xf32>
    %8 = arith.divf %6, %7 : vector<16x1xf32>
    %9 = vector.broadcast %8 : vector<16x1xf32> to vector<16x128xf32>
    %10 = arith.subf %2, %9 : vector<16x128xf32>
    %11 = arith.mulf %10, %10 : vector<16x128xf32>
    %cst_7 = arith.constant dense<0.000000e+00> : vector<16xf32>
    %12 = vector.multi_reduction <add>, %11, %cst_7 [1] : vector<16x128xf32> to vector<16xf32>
    %13 = vector.shape_cast %12 : vector<16xf32> to vector<16x1xf32>
    %cst_8 = arith.constant 1.280000e+02 : f32
    %14 = vector.broadcast %cst_8 : f32 to vector<16x1xf32>
    %15 = arith.divf %13, %14 : vector<16x1xf32>
    %cst_9 = arith.constant 9.99999997E-7 : f32
    %16 = vector.broadcast %cst_9 : f32 to vector<16x1xf32>
    %17 = arith.addf %15, %16 : vector<16x1xf32>
    %18 = math.rsqrt %17 : vector<16x1xf32>
    %19 = vector.broadcast %18 : vector<16x1xf32> to vector<16x128xf32>
    %20 = arith.mulf %10, %19 : vector<16x128xf32>
    %21 = vector.broadcast %3 : vector<1x128xf32> to vector<16x128xf32>
    %22 = arith.mulf %20, %21 : vector<16x128xf32>
    %23 = vector.broadcast %4 : vector<1x128xf32> to vector<16x128xf32>
    %24 = arith.addf %22, %23 : vector<16x128xf32>
    %25 = arith.truncf %24 : vector<16x128xf32> to vector<16x128xbf16>
    %c0_10 = arith.constant 0 : index
    %c0_11 = arith.constant 0 : index
    %26 = vector.load %arg4[%c0_10, %c0_11] : memref<128x384xbf16, #tpu.memory_space<vmem>>, vector<128x384xbf16>
    %cst_12 = arith.constant dense<0.000000e+00> : vector<16x384xf32>
    %27 = tpu.matmul %25, %26, %cst_12 {dimension_numbers = #tpu.dot_dimension_numbers<[1], [0], [0], [1], [0, 0, 1, 1], [], []>} : vector<16x128xbf16>, vector<128x384xbf16>, vector<16x384xf32> -> vector<16x384xf32>
    %c0_13 = arith.constant 0 : index
    %c0_14 = arith.constant 0 : index
    %28 = vector.load %arg5[%c0_13, %c0_14] : memref<1x384xf32, #tpu.memory_space<vmem>>, vector<1x384xf32>
    %29 = vector.broadcast %28 : vector<1x384xf32> to vector<16x384xf32>
    %30 = arith.addf %27, %29 : vector<16x384xf32>
    %31 = arith.truncf %30 : vector<16x384xf32> to vector<16x384xbf16>
    %32 = vector.shape_cast %31 : vector<16x384xbf16> to vector<2x8x384xbf16>
    %33 = tpu.iota {dimensions = array<i32: 2>} : vector<2x8x8xi32>
    %c5_i32 = arith.constant 5 : i32
    %34 = vector.broadcast %c5_i32 : i32 to vector<2x8x8xi32>
    %35 = arith.cmpi slt, %33, %34 : vector<2x8x8xi32>
    %cst_15 = arith.constant 0.000000e+00 : f32
    %36 = vector.broadcast %cst_15 : f32 to vector<16x128xf32>
    %37 = vector.extract_strided_slice %32 {offsets = [0, 0, 0], sizes = [2, 8, 32], strides = [1, 1, 1]} : vector<2x8x384xbf16> to vector<2x8x32xbf16>
    %38 = vector.extract_strided_slice %32 {offsets = [0, 0, 128], sizes = [2, 8, 32], strides = [1, 1, 1]} : vector<2x8x384xbf16> to vector<2x8x32xbf16>
    %39 = vector.extract_strided_slice %32 {offsets = [0, 0, 256], sizes = [2, 8, 32], strides = [1, 1, 1]} : vector<2x8x384xbf16> to vector<2x8x32xbf16>
    "tpu.trace_start"() <{level = 10 : i32, message = "bqd,bkd->bqk"}> : () -> ()
    %cst_16 = arith.constant dense<0.000000e+00> : vector<2x8x8xf32>
    %40 = tpu.matmul %37, %38, %cst_16 {dimension_numbers = #tpu.dot_dimension_numbers<[2], [2], [1], [1], [0, 0, 0, 1, 1, 1], [0], [0]>} : vector<2x8x32xbf16>, vector<2x8x32xbf16>, vector<2x8x8xf32> -> vector<2x8x8xf32>
    "tpu.trace_stop"() : () -> ()
    %cst_17 = arith.constant 0.176776692 : f32
    %41 = vector.broadcast %cst_17 : f32 to vector<2x8x8xf32>
    %42 = arith.mulf %40, %41 : vector<2x8x8xf32>
    %cst_18 = arith.constant -1.000000e+30 : f32
    %43 = vector.broadcast %cst_18 : f32 to vector<2x8x8xf32>
    %44 = arith.select %35, %42, %43 : vector<2x8x8xi1>, vector<2x8x8xf32>
    %cst_19 = arith.constant dense<0xFF800000> : vector<2x8xf32>
    %45 = vector.multi_reduction <maximumf>, %44, %cst_19 [2] : vector<2x8x8xf32> to vector<2x8xf32>
    %46 = vector.shape_cast %45 : vector<2x8xf32> to vector<2x8x1xf32>
    %47 = vector.broadcast %46 : vector<2x8x1xf32> to vector<2x8x8xf32>
    %48 = arith.subf %44, %47 : vector<2x8x8xf32>
    %49 = math.exp %48 : vector<2x8x8xf32>
    %cst_20 = arith.constant dense<0.000000e+00> : vector<2x8xf32>
    %50 = vector.multi_reduction <add>, %49, %cst_20 [2] : vector<2x8x8xf32> to vector<2x8xf32>
    %51 = vector.shape_cast %50 : vector<2x8xf32> to vector<2x8x1xf32>
    %52 = tpu.reciprocal %51 {approx = true} : vector<2x8x1xf32> -> vector<2x8x1xf32>
    %53 = vector.broadcast %52 : vector<2x8x1xf32> to vector<2x8x8xf32>
    %54 = arith.mulf %49, %53 : vector<2x8x8xf32>
    %55 = arith.truncf %54 : vector<2x8x8xf32> to vector<2x8x8xbf16>
    "tpu.trace_start"() <{level = 10 : i32, message = "bqk,bkd->bqd"}> : () -> ()
    %cst_21 = arith.constant dense<0.000000e+00> : vector<2x8x32xf32>
    %56 = tpu.matmul %55, %39, %cst_21 {dimension_numbers = #tpu.dot_dimension_numbers<[2], [1], [1], [2], [0, 0, 0, 1, 1, 2], [0], [0]>} : vector<2x8x8xbf16>, vector<2x8x32xbf16>, vector<2x8x32xf32> -> vector<2x8x32xf32>
    "tpu.trace_stop"() : () -> ()
    %57 = vector.shape_cast %56 : vector<2x8x32xf32> to vector<16x32xf32>
    %58 = arith.truncf %57 : vector<16x32xf32> to vector<16x32xbf16>
    %c0_22 = arith.constant 0 : index
    %c0_23 = arith.constant 0 : index
    %59 = vector.load %arg6[%c0_22, %c0_23] : memref<128x128xbf16, #tpu.memory_space<vmem>>, vector<32x128xbf16>
    %cst_24 = arith.constant dense<0.000000e+00> : vector<16x128xf32>
    %60 = tpu.matmul %58, %59, %cst_24 {dimension_numbers = #tpu.dot_dimension_numbers<[1], [0], [0], [1], [0, 0, 1, 1], [], []>} : vector<16x32xbf16>, vector<32x128xbf16>, vector<16x128xf32> -> vector<16x128xf32>
    %61 = arith.addf %36, %60 : vector<16x128xf32>
    %62 = vector.extract_strided_slice %32 {offsets = [0, 0, 32], sizes = [2, 8, 32], strides = [1, 1, 1]} : vector<2x8x384xbf16> to vector<2x8x32xbf16>
    %63 = vector.extract_strided_slice %32 {offsets = [0, 0, 160], sizes = [2, 8, 32], strides = [1, 1, 1]} : vector<2x8x384xbf16> to vector<2x8x32xbf16>
    %64 = vector.extract_strided_slice %32 {offsets = [0, 0, 288], sizes = [2, 8, 32], strides = [1, 1, 1]} : vector<2x8x384xbf16> to vector<2x8x32xbf16>
    "tpu.trace_start"() <{level = 10 : i32, message = "bqd,bkd->bqk"}> : () -> ()
    %cst_25 = arith.constant dense<0.000000e+00> : vector<2x8x8xf32>
    %65 = tpu.matmul %62, %63, %cst_25 {dimension_numbers = #tpu.dot_dimension_numbers<[2], [2], [1], [1], [0, 0, 0, 1, 1, 1], [0], [0]>} : vector<2x8x32xbf16>, vector<2x8x32xbf16>, vector<2x8x8xf32> -> vector<2x8x8xf32>
    "tpu.trace_stop"() : () -> ()
    %cst_26 = arith.constant 0.176776692 : f32
    %66 = vector.broadcast %cst_26 : f32 to vector<2x8x8xf32>
    %67 = arith.mulf %65, %66 : vector<2x8x8xf32>
    %cst_27 = arith.constant -1.000000e+30 : f32
    %68 = vector.broadcast %cst_27 : f32 to vector<2x8x8xf32>
    %69 = arith.select %35, %67, %68 : vector<2x8x8xi1>, vector<2x8x8xf32>
    %cst_28 = arith.constant dense<0xFF800000> : vector<2x8xf32>
    %70 = vector.multi_reduction <maximumf>, %69, %cst_28 [2] : vector<2x8x8xf32> to vector<2x8xf32>
    %71 = vector.shape_cast %70 : vector<2x8xf32> to vector<2x8x1xf32>
    %72 = vector.broadcast %71 : vector<2x8x1xf32> to vector<2x8x8xf32>
    %73 = arith.subf %69, %72 : vector<2x8x8xf32>
    %74 = math.exp %73 : vector<2x8x8xf32>
    %cst_29 = arith.constant dense<0.000000e+00> : vector<2x8xf32>
    %75 = vector.multi_reduction <add>, %74, %cst_29 [2] : vector<2x8x8xf32> to vector<2x8xf32>
    %76 = vector.shape_cast %75 : vector<2x8xf32> to vector<2x8x1xf32>
    %77 = tpu.reciprocal %76 {approx = true} : vector<2x8x1xf32> -> vector<2x8x1xf32>
    %78 = vector.broadcast %77 : vector<2x8x1xf32> to vector<2x8x8xf32>
    %79 = arith.mulf %74, %78 : vector<2x8x8xf32>
    %80 = arith.truncf %79 : vector<2x8x8xf32> to vector<2x8x8xbf16>
    "tpu.trace_start"() <{level = 10 : i32, message = "bqk,bkd->bqd"}> : () -> ()
    %cst_30 = arith.constant dense<0.000000e+00> : vector<2x8x32xf32>
    %81 = tpu.matmul %80, %64, %cst_30 {dimension_numbers = #tpu.dot_dimension_numbers<[2], [1], [1], [2], [0, 0, 0, 1, 1, 2], [0], [0]>} : vector<2x8x8xbf16>, vector<2x8x32xbf16>, vector<2x8x32xf32> -> vector<2x8x32xf32>
    "tpu.trace_stop"() : () -> ()
    %82 = vector.shape_cast %81 : vector<2x8x32xf32> to vector<16x32xf32>
    %83 = arith.truncf %82 : vector<16x32xf32> to vector<16x32xbf16>
    %c32 = arith.constant 32 : index
    %c0_31 = arith.constant 0 : index
    %84 = vector.load %arg6[%c32, %c0_31] : memref<128x128xbf16, #tpu.memory_space<vmem>>, vector<32x128xbf16>
    %cst_32 = arith.constant dense<0.000000e+00> : vector<16x128xf32>
    %85 = tpu.matmul %83, %84, %cst_32 {dimension_numbers = #tpu.dot_dimension_numbers<[1], [0], [0], [1], [0, 0, 1, 1], [], []>} : vector<16x32xbf16>, vector<32x128xbf16>, vector<16x128xf32> -> vector<16x128xf32>
    %86 = arith.addf %61, %85 : vector<16x128xf32>
    %87 = vector.extract_strided_slice %32 {offsets = [0, 0, 64], sizes = [2, 8, 32], strides = [1, 1, 1]} : vector<2x8x384xbf16> to vector<2x8x32xbf16>
    %88 = vector.extract_strided_slice %32 {offsets = [0, 0, 192], sizes = [2, 8, 32], strides = [1, 1, 1]} : vector<2x8x384xbf16> to vector<2x8x32xbf16>
    %89 = vector.extract_strided_slice %32 {offsets = [0, 0, 320], sizes = [2, 8, 32], strides = [1, 1, 1]} : vector<2x8x384xbf16> to vector<2x8x32xbf16>
    "tpu.trace_start"() <{level = 10 : i32, message = "bqd,bkd->bqk"}> : () -> ()
    %cst_33 = arith.constant dense<0.000000e+00> : vector<2x8x8xf32>
    %90 = tpu.matmul %87, %88, %cst_33 {dimension_numbers = #tpu.dot_dimension_numbers<[2], [2], [1], [1], [0, 0, 0, 1, 1, 1], [0], [0]>} : vector<2x8x32xbf16>, vector<2x8x32xbf16>, vector<2x8x8xf32> -> vector<2x8x8xf32>
    "tpu.trace_stop"() : () -> ()
    %cst_34 = arith.constant 0.176776692 : f32
    %91 = vector.broadcast %cst_34 : f32 to vector<2x8x8xf32>
    %92 = arith.mulf %90, %91 : vector<2x8x8xf32>
    %cst_35 = arith.constant -1.000000e+30 : f32
    %93 = vector.broadcast %cst_35 : f32 to vector<2x8x8xf32>
    %94 = arith.select %35, %92, %93 : vector<2x8x8xi1>, vector<2x8x8xf32>
    %cst_36 = arith.constant dense<0xFF800000> : vector<2x8xf32>
    %95 = vector.multi_reduction <maximumf>, %94, %cst_36 [2] : vector<2x8x8xf32> to vector<2x8xf32>
    %96 = vector.shape_cast %95 : vector<2x8xf32> to vector<2x8x1xf32>
    %97 = vector.broadcast %96 : vector<2x8x1xf32> to vector<2x8x8xf32>
    %98 = arith.subf %94, %97 : vector<2x8x8xf32>
    %99 = math.exp %98 : vector<2x8x8xf32>
    %cst_37 = arith.constant dense<0.000000e+00> : vector<2x8xf32>
    %100 = vector.multi_reduction <add>, %99, %cst_37 [2] : vector<2x8x8xf32> to vector<2x8xf32>
    %101 = vector.shape_cast %100 : vector<2x8xf32> to vector<2x8x1xf32>
    %102 = tpu.reciprocal %101 {approx = true} : vector<2x8x1xf32> -> vector<2x8x1xf32>
    %103 = vector.broadcast %102 : vector<2x8x1xf32> to vector<2x8x8xf32>
    %104 = arith.mulf %99, %103 : vector<2x8x8xf32>
    %105 = arith.truncf %104 : vector<2x8x8xf32> to vector<2x8x8xbf16>
    "tpu.trace_start"() <{level = 10 : i32, message = "bqk,bkd->bqd"}> : () -> ()
    %cst_38 = arith.constant dense<0.000000e+00> : vector<2x8x32xf32>
    %106 = tpu.matmul %105, %89, %cst_38 {dimension_numbers = #tpu.dot_dimension_numbers<[2], [1], [1], [2], [0, 0, 0, 1, 1, 2], [0], [0]>} : vector<2x8x8xbf16>, vector<2x8x32xbf16>, vector<2x8x32xf32> -> vector<2x8x32xf32>
    "tpu.trace_stop"() : () -> ()
    %107 = vector.shape_cast %106 : vector<2x8x32xf32> to vector<16x32xf32>
    %108 = arith.truncf %107 : vector<16x32xf32> to vector<16x32xbf16>
    %c64 = arith.constant 64 : index
    %c0_39 = arith.constant 0 : index
    %109 = vector.load %arg6[%c64, %c0_39] : memref<128x128xbf16, #tpu.memory_space<vmem>>, vector<32x128xbf16>
    %cst_40 = arith.constant dense<0.000000e+00> : vector<16x128xf32>
    %110 = tpu.matmul %108, %109, %cst_40 {dimension_numbers = #tpu.dot_dimension_numbers<[1], [0], [0], [1], [0, 0, 1, 1], [], []>} : vector<16x32xbf16>, vector<32x128xbf16>, vector<16x128xf32> -> vector<16x128xf32>
    %111 = arith.addf %86, %110 : vector<16x128xf32>
    %112 = vector.extract_strided_slice %32 {offsets = [0, 0, 96], sizes = [2, 8, 32], strides = [1, 1, 1]} : vector<2x8x384xbf16> to vector<2x8x32xbf16>
    %113 = vector.extract_strided_slice %32 {offsets = [0, 0, 224], sizes = [2, 8, 32], strides = [1, 1, 1]} : vector<2x8x384xbf16> to vector<2x8x32xbf16>
    %114 = vector.extract_strided_slice %32 {offsets = [0, 0, 352], sizes = [2, 8, 32], strides = [1, 1, 1]} : vector<2x8x384xbf16> to vector<2x8x32xbf16>
    "tpu.trace_start"() <{level = 10 : i32, message = "bqd,bkd->bqk"}> : () -> ()
    %cst_41 = arith.constant dense<0.000000e+00> : vector<2x8x8xf32>
    %115 = tpu.matmul %112, %113, %cst_41 {dimension_numbers = #tpu.dot_dimension_numbers<[2], [2], [1], [1], [0, 0, 0, 1, 1, 1], [0], [0]>} : vector<2x8x32xbf16>, vector<2x8x32xbf16>, vector<2x8x8xf32> -> vector<2x8x8xf32>
    "tpu.trace_stop"() : () -> ()
    %cst_42 = arith.constant 0.176776692 : f32
    %116 = vector.broadcast %cst_42 : f32 to vector<2x8x8xf32>
    %117 = arith.mulf %115, %116 : vector<2x8x8xf32>
    %cst_43 = arith.constant -1.000000e+30 : f32
    %118 = vector.broadcast %cst_43 : f32 to vector<2x8x8xf32>
    %119 = arith.select %35, %117, %118 : vector<2x8x8xi1>, vector<2x8x8xf32>
    %cst_44 = arith.constant dense<0xFF800000> : vector<2x8xf32>
    %120 = vector.multi_reduction <maximumf>, %119, %cst_44 [2] : vector<2x8x8xf32> to vector<2x8xf32>
    %121 = vector.shape_cast %120 : vector<2x8xf32> to vector<2x8x1xf32>
    %122 = vector.broadcast %121 : vector<2x8x1xf32> to vector<2x8x8xf32>
    %123 = arith.subf %119, %122 : vector<2x8x8xf32>
    %124 = math.exp %123 : vector<2x8x8xf32>
    %cst_45 = arith.constant dense<0.000000e+00> : vector<2x8xf32>
    %125 = vector.multi_reduction <add>, %124, %cst_45 [2] : vector<2x8x8xf32> to vector<2x8xf32>
    %126 = vector.shape_cast %125 : vector<2x8xf32> to vector<2x8x1xf32>
    %127 = tpu.reciprocal %126 {approx = true} : vector<2x8x1xf32> -> vector<2x8x1xf32>
    %128 = vector.broadcast %127 : vector<2x8x1xf32> to vector<2x8x8xf32>
    %129 = arith.mulf %124, %128 : vector<2x8x8xf32>
    %130 = arith.truncf %129 : vector<2x8x8xf32> to vector<2x8x8xbf16>
    "tpu.trace_start"() <{level = 10 : i32, message = "bqk,bkd->bqd"}> : () -> ()
    %cst_46 = arith.constant dense<0.000000e+00> : vector<2x8x32xf32>
    %131 = tpu.matmul %130, %114, %cst_46 {dimension_numbers = #tpu.dot_dimension_numbers<[2], [1], [1], [2], [0, 0, 0, 1, 1, 2], [0], [0]>} : vector<2x8x8xbf16>, vector<2x8x32xbf16>, vector<2x8x32xf32> -> vector<2x8x32xf32>
    "tpu.trace_stop"() : () -> ()
    %132 = vector.shape_cast %131 : vector<2x8x32xf32> to vector<16x32xf32>
    %133 = arith.truncf %132 : vector<16x32xf32> to vector<16x32xbf16>
    %c96 = arith.constant 96 : index
    %c0_47 = arith.constant 0 : index
    %134 = vector.load %arg6[%c96, %c0_47] : memref<128x128xbf16, #tpu.memory_space<vmem>>, vector<32x128xbf16>
    %cst_48 = arith.constant dense<0.000000e+00> : vector<16x128xf32>
    %135 = tpu.matmul %133, %134, %cst_48 {dimension_numbers = #tpu.dot_dimension_numbers<[1], [0], [0], [1], [0, 0, 1, 1], [], []>} : vector<16x32xbf16>, vector<32x128xbf16>, vector<16x128xf32> -> vector<16x128xf32>
    %136 = arith.addf %111, %135 : vector<16x128xf32>
    %137 = arith.extf %1 : vector<16x128xbf16> to vector<16x128xf32>
    %138 = arith.addf %137, %136 : vector<16x128xf32>
    %c0_49 = arith.constant 0 : index
    %c0_50 = arith.constant 0 : index
    %139 = vector.load %arg7[%c0_49, %c0_50] : memref<1x128xf32, #tpu.memory_space<vmem>>, vector<1x128xf32>
    %140 = vector.broadcast %139 : vector<1x128xf32> to vector<16x128xf32>
    %141 = arith.addf %138, %140 : vector<16x128xf32>
    %c0_51 = arith.constant 0 : index
    %c0_52 = arith.constant 0 : index
    %142 = vector.load %arg8[%c0_51, %c0_52] : memref<1x128xf32, #tpu.memory_space<vmem>>, vector<1x128xf32>
    %c0_53 = arith.constant 0 : index
    %c0_54 = arith.constant 0 : index
    %143 = vector.load %arg9[%c0_53, %c0_54] : memref<1x128xf32, #tpu.memory_space<vmem>>, vector<1x128xf32>
    %cst_55 = arith.constant dense<0.000000e+00> : vector<16xf32>
    %144 = vector.multi_reduction <add>, %141, %cst_55 [1] : vector<16x128xf32> to vector<16xf32>
    %145 = vector.shape_cast %144 : vector<16xf32> to vector<16x1xf32>
    %cst_56 = arith.constant 1.280000e+02 : f32
    %146 = vector.broadcast %cst_56 : f32 to vector<16x1xf32>
    %147 = arith.divf %145, %146 : vector<16x1xf32>
    %148 = vector.broadcast %147 : vector<16x1xf32> to vector<16x128xf32>
    %149 = arith.subf %141, %148 : vector<16x128xf32>
    %150 = arith.mulf %149, %149 : vector<16x128xf32>
    %cst_57 = arith.constant dense<0.000000e+00> : vector<16xf32>
    %151 = vector.multi_reduction <add>, %150, %cst_57 [1] : vector<16x128xf32> to vector<16xf32>
    %152 = vector.shape_cast %151 : vector<16xf32> to vector<16x1xf32>
    %cst_58 = arith.constant 1.280000e+02 : f32
    %153 = vector.broadcast %cst_58 : f32 to vector<16x1xf32>
    %154 = arith.divf %152, %153 : vector<16x1xf32>
    %cst_59 = arith.constant 9.99999997E-7 : f32
    %155 = vector.broadcast %cst_59 : f32 to vector<16x1xf32>
    %156 = arith.addf %154, %155 : vector<16x1xf32>
    %157 = math.rsqrt %156 : vector<16x1xf32>
    %158 = vector.broadcast %157 : vector<16x1xf32> to vector<16x128xf32>
    %159 = arith.mulf %149, %158 : vector<16x128xf32>
    %160 = vector.broadcast %142 : vector<1x128xf32> to vector<16x128xf32>
    %161 = arith.mulf %159, %160 : vector<16x128xf32>
    %162 = vector.broadcast %143 : vector<1x128xf32> to vector<16x128xf32>
    %163 = arith.addf %161, %162 : vector<16x128xf32>
    %164 = arith.truncf %163 : vector<16x128xf32> to vector<16x128xbf16>
    %c0_60 = arith.constant 0 : index
    %c0_61 = arith.constant 0 : index
    %165 = vector.load %arg10[%c0_60, %c0_61] : memref<128x512xbf16, #tpu.memory_space<vmem>>, vector<128x512xbf16>
    %cst_62 = arith.constant dense<0.000000e+00> : vector<16x512xf32>
    %166 = tpu.matmul %164, %165, %cst_62 {dimension_numbers = #tpu.dot_dimension_numbers<[1], [0], [0], [1], [0, 0, 1, 1], [], []>} : vector<16x128xbf16>, vector<128x512xbf16>, vector<16x512xf32> -> vector<16x512xf32>
    %c0_63 = arith.constant 0 : index
    %c0_64 = arith.constant 0 : index
    %167 = vector.load %arg11[%c0_63, %c0_64] : memref<1x512xf32, #tpu.memory_space<vmem>>, vector<1x512xf32>
    %168 = vector.broadcast %167 : vector<1x512xf32> to vector<16x512xf32>
    %169 = arith.addf %166, %168 : vector<16x512xf32>
    %cst_65 = arith.constant 5.000000e-01 : f32
    %170 = vector.broadcast %cst_65 : f32 to vector<16x512xf32>
    %171 = arith.mulf %170, %169 : vector<16x512xf32>
    %cst_66 = arith.constant 0.707106769 : f32
    %172 = vector.broadcast %cst_66 : f32 to vector<16x512xf32>
    %173 = arith.mulf %169, %172 : vector<16x512xf32>
    %174 = math.erf %173 : vector<16x512xf32>
    %cst_67 = arith.constant 1.000000e+00 : f32
    %175 = vector.broadcast %cst_67 : f32 to vector<16x512xf32>
    %176 = arith.addf %175, %174 : vector<16x512xf32>
    %177 = arith.mulf %171, %176 : vector<16x512xf32>
    %178 = arith.truncf %177 : vector<16x512xf32> to vector<16x512xbf16>
    %c0_68 = arith.constant 0 : index
    %c0_69 = arith.constant 0 : index
    %179 = vector.load %arg12[%c0_68, %c0_69] : memref<512x128xbf16, #tpu.memory_space<vmem>>, vector<512x128xbf16>
    %cst_70 = arith.constant dense<0.000000e+00> : vector<16x128xf32>
    %180 = tpu.matmul %178, %179, %cst_70 {dimension_numbers = #tpu.dot_dimension_numbers<[1], [0], [0], [1], [0, 0, 1, 1], [], []>} : vector<16x512xbf16>, vector<512x128xbf16>, vector<16x128xf32> -> vector<16x128xf32>
    %c0_71 = arith.constant 0 : index
    %c0_72 = arith.constant 0 : index
    %181 = vector.load %arg13[%c0_71, %c0_72] : memref<1x128xf32, #tpu.memory_space<vmem>>, vector<1x128xf32>
    %182 = vector.broadcast %181 : vector<1x128xf32> to vector<16x128xf32>
    %183 = arith.addf %180, %182 : vector<16x128xf32>
    %184 = arith.addf %141, %183 : vector<16x128xf32>
    %185 = vector.shape_cast %184 : vector<16x128xf32> to vector<2x8x128xf32>
    %186 = arith.truncf %185 : vector<2x8x128xf32> to vector<2x8x128xbf16>
    %c0_73 = arith.constant 0 : index
    %c0_74 = arith.constant 0 : index
    %c0_75 = arith.constant 0 : index
    %187 = vector.load %arg14[%c0_73, %c0_74, %c0_75] : memref<2x8x128xbf16, #tpu.memory_space<vmem>>, vector<2x8x128xbf16>
    tpu.vector_store %arg14[%c0_73, %c0_74, %c0_75], %186 {strides = array<i32>} : memref<2x8x128xbf16, #tpu.memory_space<vmem>>, vector<2x8x128xbf16>,
    return
  }
  func.func @transform_0(%arg0: i32) -> (i32, i32, i32) {
    %c0_i32 = arith.constant 0 : i32
    %c0_i32_0 = arith.constant 0 : i32
    %c0_i32_1 = arith.constant 0 : i32
    return %arg0, %c0_i32, %c0_i32_0 : i32, i32, i32
  }
  func.func @transform_1(%arg0: i32) -> (i32, i32) {
    %c0_i32 = arith.constant 0 : i32
    %c0_i32_0 = arith.constant 0 : i32
    %c0_i32_1 = arith.constant 0 : i32
    return %c0_i32, %c0_i32_0 : i32, i32
  }
  func.func @transform_2(%arg0: i32) -> (i32, i32) {
    %c0_i32 = arith.constant 0 : i32
    %c0_i32_0 = arith.constant 0 : i32
    %c0_i32_1 = arith.constant 0 : i32
    return %c0_i32, %c0_i32_0 : i32, i32
  }
  func.func @transform_3(%arg0: i32) -> (i32, i32) {
    %c0_i32 = arith.constant 0 : i32
    %c0_i32_0 = arith.constant 0 : i32
    %c0_i32_1 = arith.constant 0 : i32
    return %c0_i32, %c0_i32_0 : i32, i32
  }
  func.func @transform_4(%arg0: i32) -> (i32, i32) {
    %c0_i32 = arith.constant 0 : i32
    %c0_i32_0 = arith.constant 0 : i32
    %c0_i32_1 = arith.constant 0 : i32
    return %c0_i32, %c0_i32_0 : i32, i32
  }
  func.func @transform_5(%arg0: i32) -> (i32, i32) {
    %c0_i32 = arith.constant 0 : i32
    %c0_i32_0 = arith.constant 0 : i32
    %c0_i32_1 = arith.constant 0 : i32
    return %c0_i32, %c0_i32_0 : i32, i32
  }
  func.func @transform_6(%arg0: i32) -> (i32, i32) {
    %c0_i32 = arith.constant 0 : i32
    %c0_i32_0 = arith.constant 0 : i32
    %c0_i32_1 = arith.constant 0 : i32
    return %c0_i32, %c0_i32_0 : i32, i32
  }
  func.func @transform_7(%arg0: i32) -> (i32, i32) {
    %c0_i32 = arith.constant 0 : i32
    %c0_i32_0 = arith.constant 0 : i32
    %c0_i32_1 = arith.constant 0 : i32
    return %c0_i32, %c0_i32_0 : i32, i32
  }
  func.func @transform_8(%arg0: i32) -> (i32, i32) {
    %c0_i32 = arith.constant 0 : i32
    %c0_i32_0 = arith.constant 0 : i32
    %c0_i32_1 = arith.constant 0 : i32
    return %c0_i32, %c0_i32_0 : i32, i32
  }
  func.func @transform_9(%arg0: i32) -> (i32, i32) {
    %c0_i32 = arith.constant 0 : i32
    %c0_i32_0 = arith.constant 0 : i32
    %c0_i32_1 = arith.constant 0 : i32
    return %c0_i32, %c0_i32_0 : i32, i32
  }
  func.func @transform_10(%arg0: i32) -> (i32, i32) {
    %c0_i32 = arith.constant 0 : i32
    %c0_i32_0 = arith.constant 0 : i32
    %c0_i32_1 = arith.constant 0 : i32
    return %c0_i32, %c0_i32_0 : i32, i32
  }
  func.func @transform_11(%arg0: i32) -> (i32, i32) {
    %c0_i32 = arith.constant 0 : i32
    %c0_i32_0 = arith.constant 0 : i32
    %c0_i32_1 = arith.constant 0 : i32
    return %c0_i32, %c0_i32_0 : i32, i32
  }
  func.func @transform_12(%arg0: i32) -> (i32, i32) {
    %c0_i32 = arith.constant 0 : i32
    %c0_i32_0 = arith.constant 0 : i32
    %c0_i32_1 = arith.constant 0 : i32
    return %c0_i32, %c0_i32_0 : i32, i32
  }
  func.func @transform_13(%arg0: i32) -> (i32, i32, i32) {
    %c0_i32 = arith.constant 0 : i32
    %c0_i32_0 = arith.constant 0 : i32
    %c0_i32_1 = arith.constant 0 : i32
    return %arg0, %c0_i32, %c0_i32_0 : i32, i32, i32
  }
}

</mosaic_0001>

<bundles_post_ra>
// kernel: a_call__.3
= control target key start
LH: loop header
LB: loop body
LE: loop exit
PB: predicated region body
PF: predicated region fallthrough
CT: control target
= control target key end

     0   :  { %s939_s1 = inlined_call_operand.vmem [shape: bf16[768,128], index: 1, kind: input, shape index: {}]   ;;  %s940_s0 = inlined_call_operand.vmem [shape: bf16[2,8,768], index: 0, kind: input, shape index: {}]   ;;  %s941_s2 = inlined_call_operand.vmem [shape: f32[1,8,128], index: 2, kind: input, shape index: {}]   ;;  %s942_s3 = inlined_call_operand.vmem [shape: bf16[2,8,128], index: 3, kind: output, shape index: {}]  }
   0x1   :  { %v694_v0 = vld [vmem:[%s939_s1 + $0x40] sm:$0xff]   ;;  %v698_v4 = vld [vmem:[%s939_s1 + $0x48] sm:$0xff]   ;;  %v702_v8 = vld [vmem:[%s939_s1 + $0x50] sm:$0xff]  }
   0x2   :  { %v695_v1 = vld [vmem:[%s939_s1 + $0xc0] sm:$0xff]   ;;  %628 = vmatprep.subr.bf16.mxu0 %v694_v0  ;;  %v699_v5 = vld [vmem:[%s939_s1 + $0xc8] sm:$0xff]   ;;  %v703_v9 = vld [vmem:[%s939_s1 + $0xd0] sm:$0xff]  }
   0x3   :  { %v696_v2 = vld [vmem:[%s939_s1] sm:$0xff]   ;;  %650 = vmatprep.subr.bf16.mxu1 %v695_v1  ;;  %v700_v6 = vld [vmem:[%s939_s1 + $0x8] sm:$0xff]   ;;  %v704_v10 = vld [vmem:[%s939_s1 + $0x10] sm:$0xff]  }
   0x4   :  { %v697_v3 = vld [vmem:[%s939_s1 + $0x80] sm:$0xff]   ;;  %629 = vmatpush3.bf16.msra.mxu0 %v696_v2  ;;  %v701_v7 = vld [vmem:[%s939_s1 + $0x88] sm:$0xff]   ;;  %v705_v11 = vld [vmem:[%s939_s1 + $0x90] sm:$0xff]  }
   0x5   :  { %651 = vmatpush3.bf16.msra.mxu1 %v697_v3  ;;  %630 = vmatprep.subr.bf16.mxu0 %v698_v4  ;;  %v706_v12 = vld [vmem:[%s939_s1 + $0x58] sm:$0xff]   ;;  %v710_v16 = vld [vmem:[%s939_s1 + $0x60] sm:$0xff]   ;;  %v714_v20 = vld [vmem:[%s939_s1 + $0x68] sm:$0xff]  }
   0x6   :  { %652 = vmatprep.subr.bf16.mxu1 %v699_v5  ;;  %v707_v13 = vld [vmem:[%s939_s1 + $0xd8] sm:$0xff]   ;;  %v711_v17 = vld [vmem:[%s939_s1 + $0xe0] sm:$0xff]   ;;  %v715_v21 = vld [vmem:[%s939_s1 + $0xe8] sm:$0xff]  }
   0x7   :  { %v708_v14 = vld [vmem:[%s939_s1 + $0x18] sm:$0xff]   ;;  %v712_v18 = vld [vmem:[%s939_s1 + $0x20] sm:$0xff]   ;;  %v716_v22 = vld [vmem:[%s939_s1 + $0x28] sm:$0xff]  }
   0x8   :  { %631 = vmatpush3.bf16.msra.mxu0 %v700_v6  ;;  %v709_v15 = vld [vmem:[%s939_s1 + $0x98] sm:$0xff]   ;;  %v713_v19 = vld [vmem:[%s939_s1 + $0xa0] sm:$0xff]   ;;  %v717_v23 = vld [vmem:[%s939_s1 + $0xa8] sm:$0xff]  }
   0x9   :  { %653 = vmatpush3.bf16.msra.mxu1 %v701_v7  ;;  %632 = vmatprep.subr.bf16.mxu0 %v702_v8  ;;  %v718_v24 = vld [vmem:[%s939_s1 + $0x70] sm:$0xff]   ;;  %v722_v28 = vld [vmem:[%s939_s1 + $0x78] sm:$0xff]   ;;  %v729_v34 = vld [vmem:[%s940_s0 + $0x8] ss:$24 sps:$4 sm:$0xff]  }
   0xa   :  { %654 = vmatprep.subr.bf16.mxu1 %v703_v9  ;;  %v719_v25 = vld [vmem:[%s939_s1 + $0xf0] sm:$0xff]   ;;  %v723_v29 = vld [vmem:[%s939_s1 + $0xf8] sm:$0xff]   ;;  %v731_v35 = vld [vmem:[%s940_s0 + $0xc] ss:$24 sps:$4 sm:$0xff]  }
   0xb   :  { %v720_v26 = vld [vmem:[%s939_s1 + $0x30] sm:$0xff]   ;;  %v724_v30 = vld [vmem:[%s939_s1 + $0x38] sm:$0xff]   ;;  %v732_v36 = vld [vmem:[%s939_s1 + $0x140] sm:$0xff]   ;;  %508 = vmatprep.mubr.bf16.mxu1 %v731_v35 }
   0xc   :  { %633 = vmatpush3.bf16.msra.mxu0 %v704_v10  ;;  %v721_v27 = vld [vmem:[%s939_s1 + $0xb0] sm:$0xff]   ;;  %v725_v31 = vld [vmem:[%s939_s1 + $0xb8] sm:$0xff]   ;;  %v733_v37 = vld [vmem:[%s939_s1 + $0x100] sm:$0xff]  }
   0xd   :  { %655 = vmatpush3.bf16.msra.mxu1 %v705_v11  ;;  %634 = vmatprep.subr.bf16.mxu0 %v706_v12  ;;  %v726_v32 = vld [vmem:[%s940_s0] ss:$24 sps:$4 sm:$0xff]   ;;  %v728_v33 = vld [vmem:[%s940_s0 + $0x4] ss:$24 sps:$4 sm:$0xff]   ;;  %v734_v38 = vld [vmem:[%s939_s1 + $0x148] sm:$0xff]  }
   0xe   :  { %656 = vmatprep.subr.bf16.mxu1 %v707_v13  ;;  %467 = vmatprep.mubr.bf16.mxu0 %v728_v33  ;;  %v735_v39 = vld [vmem:[%s939_s1 + $0x108] sm:$0xff]   ;;  %v736_v40 = vld [vmem:[%s939_s1 + $0x150] sm:$0xff]   ;;  %v738_v42 = vld [vmem:[%s939_s1 + $0x158] sm:$0xff]  }
   0xf   :  { %v737_v41 = vld [vmem:[%s939_s1 + $0x110] sm:$0xff]   ;;  %v739_v43 = vld [vmem:[%s939_s1 + $0x118] sm:$0xff]   ;;  %v740_v44 = vld [vmem:[%s939_s1 + $0x160] sm:$0xff]  }
  0x10   :  { %635 = vmatpush3.bf16.msra.mxu0 %v708_v14  ;;  %v741_v45 = vld [vmem:[%s939_s1 + $0x120] sm:$0xff]   ;;  %v742_v46 = vld [vmem:[%s939_s1 + $0x168] sm:$0xff]   ;;  %v744_v49 = vld [vmem:[%s939_s1 + $0x170] sm:$0xff]  }
  0x11   :  { %657 = vmatpush3.bf16.msra.mxu1 %v709_v15  ;;  %636 = vmatprep.subr.bf16.mxu0 %v710_v16  ;;  %v750_v47 = vld [vmem:[%s940_s0 + $0x14] ss:$24 sps:$4 sm:$0xff]   ;;  %v746_v51 = vld [vmem:[%s939_s1 + $0x178] sm:$0xff]   ;;  %v748_v53 = vld [vmem:[%s940_s0 + $0x10] ss:$24 sps:$4 sm:$0xff]  }
  0x12   :  { %658 = vmatprep.subr.bf16.mxu1 %v711_v17  ;;  %v743_v48 = vld [vmem:[%s939_s1 + $0x128] sm:$0xff]   ;;  %v745_v50 = vld [vmem:[%s939_s1 + $0x130] sm:$0xff]   ;;  %v747_v52 = vld [vmem:[%s939_s1 + $0x138] sm:$0xff]  }
  0x13   :  { %v558_v11 = vld [vmem:[%s941_s2] sm:$0xff] }
  0x14   :  { %637 = vmatpush3.bf16.msra.mxu0 %v712_v18 }
  0x15   :  { %659 = vmatpush3.bf16.msra.mxu1 %v713_v19  ;;  %638 = vmatprep.subr.bf16.mxu0 %v714_v20 }
  0x16   :  { %660 = vmatprep.subr.bf16.mxu1 %v715_v21 }
  0x18   :  { %639 = vmatpush3.bf16.msra.mxu0 %v716_v22 }
  0x19   :  { %661 = vmatpush3.bf16.msra.mxu1 %v717_v23  ;;  %640 = vmatprep.subr.bf16.mxu0 %v718_v24 }
  0x1a   :  { %662 = vmatprep.subr.bf16.mxu1 %v719_v25 }
  0x1c   :  { %641 = vmatpush3.bf16.msra.mxu0 %v720_v26 }
  0x1d   :  { %663 = vmatpush3.bf16.msra.mxu1 %v721_v27  ;;  %642 = vmatprep.subr.bf16.mxu0 %v722_v28 }
  0x1e   :  { %664 = vmatprep.subr.bf16.mxu1 %v723_v29 }
  0x20   :  { %643 = vmatpush3.bf16.msra.mxu0 %v724_v30 }
  0x21   :  { %665 = vmatpush3.bf16.msra.mxu1 %v725_v31  ;;  %672 = vmatprep.subr.bf16.mxu0 %v732_v36 }
  0x23   :  { %468 = vmatmul.mubr.bf16.vlgmr.msra.gmra.mrb[0].mxu0 %v726_v32 }
  0x24   :  { %509 = vmatmul.mubr.bf16.vlgmr.msra.gmra.mrb[0].mxu1 %v729_v34  ;;  %673 = vmatpush3.bf16.msra.mxu0 %v733_v37 }
  0x25   :  { %674 = vmatprep.subr.bf16.mxu0 %v734_v38  ;;  %549 = vmatprep.mubr.bf16.mxu0 %v750_v47 }
  0x28   :  { %675 = vmatpush3.bf16.msra.mxu0 %v735_v39 }
  0x29   :  { %676 = vmatprep.subr.bf16.mxu0 %v736_v40 }
  0x2c   :  { %677 = vmatpush3.bf16.msra.mxu0 %v737_v41 }
  0x2d   :  { %678 = vmatprep.subr.bf16.mxu0 %v738_v42 }
  0x30   :  { %679 = vmatpush3.bf16.msra.mxu0 %v739_v43 }
  0x31   :  { %680 = vmatprep.subr.bf16.mxu0 %v740_v44 }
  0x34   :  { %681 = vmatpush3.bf16.msra.mxu0 %v741_v45 }
  0x35   :  { %682 = vmatprep.subr.bf16.mxu0 %v742_v46 }
  0x38   :  { %683 = vmatpush3.bf16.msra.mxu0 %v743_v48 }
  0x39   :  { %684 = vmatprep.subr.bf16.mxu0 %v744_v49 }
  0x3c   :  { %685 = vmatpush3.bf16.msra.mxu0 %v745_v50 }
  0x3d   :  { %686 = vmatprep.subr.bf16.mxu0 %v746_v51 }
  0x40   :  { %687 = vmatpush3.bf16.msra.mxu0 %v747_v52 }
  0x43   :  { %550 = vmatmul.mubr.bf16.vlgmr.msra.gmra.mrb[4].mxu0 %v748_v53 }
  0xf6   :  { %v644_v54 = vpop.f32.mrb[0].mxu0 }
  0xf7   :  { %v666_v55 = vpop.f32.mrb[0].mxu1  ;;  %v645_v56 = vpop.f32.mrb[1].mxu0 }
  0xf8   :  { %v646_v57 = vadd.f32 %v645_v56, %v644_v54  ;;  %v667_v58 = vpop.f32.mrb[1].mxu1  ;;  %v647_v59 = vpop.f32.mrb[2].mxu0 }
  0xf9   :  { %v668_v60 = vadd.f32 %v667_v58, %v666_v55  ;;  %v669_v61 = vpop.f32.mrb[2].mxu1  ;;  %v648_v62 = vpop.f32.mrb[3].mxu0 }
  0xfa   :  { %v649_v63 = vadd.f32 %v648_v62, %v647_v59  ;;  %v670_v0 = vpop.f32.mrb[3].mxu1 }
  0xfb   :  { %v511_v1 = vadd.f32 %v668_v60, %v646_v57  ;;  %v671_v2 = vadd.f32 %v670_v0, %v669_v61 }
  0xfd   :  { %v514_v3 = vadd.f32 %v671_v2, %v649_v63 }
 0x116   :  { %v688_v4 = vpop.f32.mrb[4].mxu0 }
 0x117   :  { %v689_v5 = vpop.f32.mrb[5].mxu0 }
 0x118   :  { %v690_v6 = vadd.f32 %v689_v5, %v688_v4  ;;  %v691_v7 = vpop.f32.mrb[6].mxu0 }
 0x119   :  { %v692_v8 = vpop.f32.mrb[7].mxu0 }
 0x11a   :  { %v552_v9 = vadd.f32 %v690_v6, %v511_v1  ;;  %v693_v10 = vadd.f32 %v692_v8, %v691_v7 }
 0x11c   :  { %v555_v12 = vadd.f32 %v693_v10, %v514_v3  ;;  %v559_v13 = vadd.f32 %v558_v11, %v552_v9 }
 0x11e   :  { %v560_v14 = vadd.f32 %v558_v11, %v555_v12 }
 0x120   :  { %v626_v15 = vpack.c.bf16 %v560_v14, %v559_v13 }
 0x122   :  { %627 = vst [vmem:[%s942_s3] sm:$0xff] %v626_v15  }

// kernel: a_call__.4
= control target key start
LH: loop header
LB: loop body
LE: loop exit
PB: predicated region body
PF: predicated region fallthrough
CT: control target
= control target key end

     0   :  { %v2837_v4 = vmov 0.0   ;;  %v2838_v31 = vmov 0   ;;  %vm2839_vm0 = vmmov 0   ;;  %v125_v54 = vlaneseq  ;;  %s2842_s15 = smov 32   ;;  %s3519_s0 = inlined_call_operand.vmem [shape: bf16[2,8,128], index: 0, kind: input, shape index: {}]   ;;  %s3520_s3 = inlined_call_operand.vmem [shape: bf16[128,384], index: 3, kind: input, shape index: {}]   ;;  %s3521_s1 = inlined_call_operand.vmem [shape: f32[1,128], index: 1, kind: input, shape index: {}, may-alias: {1,7}]   ;;  %s3522_s2 = inlined_call_operand.vmem [shape: f32[1,128], index: 2, kind: input, shape index: {}, may-alias: {2,6,8,12}]   ;;  %s3523_s4 = inlined_call_operand.vmem [shape: f32[1,384], index: 4, kind: input, shape index: {}]   ;;  %s3524_s5 = inlined_call_operand.vmem [shape: bf16[128,128], index: 5, kind: input, shape index: {}]   ;;  %s3525_s6 = inlined_call_operand.vmem [shape: f32[1,128], index: 6, kind: input, shape index: {}, may-alias: {2,6,8,12}]   ;;  %s3526_s9 = inlined_call_operand.vmem [shape: bf16[128,512], index: 9, kind: input, shape index: {}]   ;;  %s3527_s11 = inlined_call_operand.vmem [shape: bf16[512,128], index: 11, kind: input, shape index: {}]   ;;  %s3528_s7 = inlined_call_operand.vmem [shape: f32[1,128], index: 7, kind: input, shape index: {}, may-alias: {1,7}]   ;;  %s3529_s8 = inlined_call_operand.vmem [shape: f32[1,128], index: 8, kind: input, shape index: {}, may-alias: {2,6,8,12}]   ;;  %s3530_s10 = inlined_call_operand.vmem [shape: f32[1,512], index: 10, kind: input, shape index: {}]   ;;  %s3531_s12 = inlined_call_operand.vmem [shape: f32[1,128], index: 12, kind: input, shape index: {}, may-alias: {2,6,8,12}]   ;;  %s3532_s13 = inlined_call_operand.vmem [shape: bf16[2,8,128], index: 13, kind: output, shape index: {}]  }
   0x1   :  { %v2402_v0 = vld [vmem:[%s3519_s0] sm:$0xff]   ;;  %2507 = vmatprep.subr.bf16.mxu1 %v2837_v4  ;;  %v2664_v6 = vld [vmem:[%s3520_s3 + $0x8] ss:$12 sps:$4 sm:$0xff]   ;;  %v2671_v19 = vld [vmem:[%s3520_s3 + $0x30] ss:$12 sps:$4 sm:$0xff]   ;;  %300 = vmatprep.mubr.bf16.mxu0 %v2838_v31  ;;  %vm372_vm1 = vcmask 261120  }
   0x2   :  { %v2916_v1 = vunpack.c.l.bf16 %v2402_v0  ;;  %v2919_v2 = vunpack.c.h.bf16 %v2402_v0  ;;  %v2661_v3 = vld [vmem:[%s3520_s3 + $0x4] ss:$12 sps:$4 sm:$0xff]   ;;  %v2663_v5 = vld [vmem:[%s3520_s3] ss:$12 sps:$4 sm:$0xff]   ;;  %v2665_v7 = vld [vmem:[%s3520_s3 + $0x1c] ss:$12 sps:$4 sm:$0xff]   ;;  %2508 = vmatpush3.bf16.msra.mxu1 %v2664_v6  ;;  %2523 = vmatprep.mubr.msk.bf16.mxu1 %vm2839_vm0, %v2837_v4 }
   0x3   :  { %268 = vmatprep.subr.bf16.mxu0 %v2661_v3  ;;  %2509 = vmatprep.subr.bf16.mxu1 %v2837_v4  ;;  %v2667_v16 = vld [vmem:[%s3520_s3 + $0x18] ss:$12 sps:$4 sm:$0xff]   ;;  %v2668_v17 = vld [vmem:[%s3520_s3 + $0x20] ss:$12 sps:$4 sm:$0xff]   ;;  %v2675_v22 = vld [vmem:[%s3520_s3 + $0x48] ss:$12 sps:$4 sm:$0xff]  }
   0x4   :  { %51 = vadd.xlane.f32.xlu0 %v2916_v1  ;;  %269 = vmatpush1.bf16.msra.mxu0 %v2663_v5  ;;  %v2669_v18 = vld [vmem:[%s3520_s3 + $0x34] ss:$12 sps:$4 sm:$0xff]   ;;  %v2672_v20 = vld [vmem:[%s3520_s3 + $0x38] ss:$12 sps:$4 sm:$0xff]   ;;  %v2676_v23 = vld [vmem:[%s3520_s3 + $0x50] ss:$12 sps:$4 sm:$0xff]  }
   0x5   :  { %270 = vmatprep.subr.bf16.mxu0 %v2665_v7  ;;  %v2673_v21 = vld [vmem:[%s3520_s3 + $0x4c] ss:$12 sps:$4 sm:$0xff]   ;;  %v2677_v24 = vld [vmem:[%s3520_s3 + $0x64] ss:$12 sps:$4 sm:$0xff]   ;;  %v2680_v26 = vld [vmem:[%s3520_s3 + $0x68] ss:$12 sps:$4 sm:$0xff]  }
   0x6   :  { %2510 = vmatpush3.bf16.msra.mxu1 %v2668_v17  ;;  %v2679_v25 = vld [vmem:[%s3520_s3 + $0x60] ss:$12 sps:$4 sm:$0xff]   ;;  %v2681_v27 = vld [vmem:[%s3520_s3 + $0x7c] ss:$12 sps:$4 sm:$0xff]   ;;  %v2683_v28 = vld [vmem:[%s3520_s3 + $0x78] ss:$12 sps:$4 sm:$0xff]  }
   0x7   :  { %2511 = vmatprep.subr.bf16.mxu1 %v2837_v4  ;;  %v2684_v29 = vld [vmem:[%s3520_s3 + $0x80] ss:$12 sps:$4 sm:$0xff]   ;;  %v2687_v32 = vld [vmem:[%s3520_s3 + $0x90] ss:$12 sps:$4 sm:$0xff]   ;;  %v2688_v33 = vld [vmem:[%s3520_s3 + $0x98] ss:$12 sps:$4 sm:$0xff]  }
   0x8   :  { %53 = vadd.xlane.f32.xlu0 %v2919_v2  ;;  %271 = vmatpush1.bf16.msra.mxu0 %v2667_v16  ;;  %v2685_v30 = vld [vmem:[%s3520_s3 + $0x94] ss:$12 sps:$4 sm:$0xff]   ;;  %v2689_v34 = vld [vmem:[%s3520_s3 + $0xac] ss:$12 sps:$4 sm:$0xff]   ;;  %v2692_v36 = vld [vmem:[%s3520_s3 + $0xb0] ss:$12 sps:$4 sm:$0xff]  }
   0x9   :  { %272 = vmatprep.subr.bf16.mxu0 %v2669_v18  ;;  %v2691_v35 = vld [vmem:[%s3520_s3 + $0xa8] ss:$12 sps:$4 sm:$0xff]   ;;  %v2267_v45 = vld [vmem:[%s3521_s1] ss:$0 sm:$0xff]  ;;  %v3029_v55 = vshrl.u32 %v125_v54, 7  ;;  %vm498_vm2 = vcmask 1043456  }
   0xa   :  { %2512 = vmatpush3.bf16.msra.mxu1 %v2672_v20  ;;  %v2268_v49 = vld [vmem:[%s3522_s2] ss:$0 sm:$0xff]  ;;  %vm470_vm4 = vcmask 64512   ;;  %s2840_s2 = smov 96  }
   0xb   :  { %2513 = vmatprep.subr.bf16.mxu1 %v2837_v4  ;;  %v127_v56 = vsub.s32 0, %v3029_v55  ;;  %v123_v57 = vld [vmem:[%s3523_s4] sm:$0x7]  ;;  %v131_v58 = vsub.s32 1, %v3029_v55  ;;  %v135_v62 = vsub.s32 2, %v3029_v55  ;;  %s2841_s4 = smov 64  }
   0xc   :  { %273 = vmatpush1.bf16.msra.mxu0 %v2671_v19 }
   0xd   :  { %274 = vmatprep.subr.bf16.mxu0 %v2673_v21  ;;  %v128_v59 = vrot.slane %v123_v57, %v127_v56  ;;  %v132_v60 = vrot.slane %v123_v57, %v131_v58 }
   0xe   :  { %2514 = vmatpush3.bf16.msra.mxu1 %v2676_v23 }
   0xf   :  { %2515 = vmatprep.subr.bf16.mxu1 %v2837_v4 }
  0x10   :  { %275 = vmatpush1.bf16.msra.mxu0 %v2675_v22 }
  0x11   :  { %276 = vmatprep.subr.bf16.mxu0 %v2677_v24 }
  0x12   :  { %2516 = vmatpush3.bf16.msra.mxu1 %v2680_v26  ;;  %v3077_v26 = vand.u32 127, %v125_v54 }
  0x13   :  { %2517 = vmatprep.subr.bf16.mxu1 %v2837_v4 }
  0x14   :  { %277 = vmatpush1.bf16.msra.mxu0 %v2679_v25  ;;  %vm370_vm3 = vcmp.lt.s32.totalorder %v3077_v26, 5 }
  0x15   :  { %278 = vmatprep.subr.bf16.mxu0 %v2681_v27 }
  0x16   :  { %2518 = vmatpush3.bf16.msra.mxu1 %v2684_v29 }
  0x17   :  { %2519 = vmatprep.subr.bf16.mxu1 %v2837_v4 }
  0x18   :  { %279 = vmatpush1.bf16.msra.mxu0 %v2683_v28 }
  0x19   :  { %280 = vmatprep.subr.bf16.mxu0 %v2685_v30 }
  0x1a   :  { %2520 = vmatpush3.bf16.msra.mxu1 %v2688_v33 }
  0x1b   :  { %2521 = vmatprep.subr.bf16.mxu1 %v2837_v4 }
  0x1c   :  { %281 = vmatpush1.bf16.msra.mxu0 %v2687_v32 }
  0x1d   :  { %282 = vmatprep.subr.bf16.mxu0 %v2689_v34 }
  0x1e   :  { %2522 = vmatpush3.bf16.msra.mxu1 %v2692_v36 }
  0x1f   :  { %2533 = vmatprep.subr.bf16.mxu1 %v2837_v4 }
  0x20   :  { %283 = vmatpush1.bf16.msra.mxu0 %v2691_v35 }
  0x21   :  { %2527 = vmatprep.subr.bf16.mxu0 %v2837_v4 }
  0x91   :  { %v52_v8 = vpop.xlane.xlu0 %51 }
  0x92   :  { %v56_v9 = vmul.f32 0.0078125, %v52_v8 }
  0x94   :  { %v2937_v10 = vsub.f32 %v2916_v1, %v56_v9 }
  0x95   :  { %v54_v11 = vpop.xlane.xlu0 %53 }
  0x96   :  { %v57_v12 = vmul.f32 0.0078125, %v54_v11  ;;  %v60_v13 = vmul.f32 %v2937_v10, %v2937_v10 }
  0x98   :  { %v2942_v14 = vsub.f32 %v2919_v2, %v57_v12  ;;  %62 = vadd.xlane.f32.xlu1 %v60_v13  ;;  %v136_v12 = vrot.slane %v123_v57, %v135_v62 }
  0x9a   :  { %v61_v15 = vmul.f32 %v2942_v14, %v2942_v14 }
  0x9c   :  { %64 = vadd.xlane.f32.xlu1 %v61_v15 }
 0x125   :  { %v63_v37 = vpop.xlane.xlu1 %62 }
 0x126   :  { %v66_v38 = vmul.f32 0.0078125, %v63_v37 }
 0x128   :  { %v68_v39 = vadd.f32 1e-06, %v66_v38 }
 0x129   :  { %v65_v40 = vpop.xlane.xlu1 %64 }
 0x12a   :  { %2781 = vrsqrt.f32 %v68_v39  ;;  %v67_v41 = vmul.f32 0.0078125, %v65_v40 }
 0x12c   :  { %v69_v42 = vadd.f32 1e-06, %v67_v41 }
 0x12e   :  { %2783 = vrsqrt.f32 %v69_v42 }
 0x134   :  { %v2782_v43 = vpop.eup %2781 }
 0x135   :  { %v72_v44 = vmul.f32 %v2782_v43, %v2937_v10 }
 0x137   :  { %v80_v48 = vmul.f32 %v2267_v45, %v72_v44 }
 0x138   :  { %v2784_v46 = vpop.eup %2783 }
 0x139   :  { %v73_v47 = vmul.f32 %v2784_v46, %v2942_v14  ;;  %v88_v51 = vadd.f32 %v2268_v49, %v80_v48 }
 0x13b   :  { %v81_v50 = vmul.f32 %v2267_v45, %v73_v47 }
 0x13d   :  { %v89_v52 = vadd.f32 %v2268_v49, %v81_v50 }
 0x13f   :  { %v90_v53 = vpack.c.bf16 %v89_v52, %v88_v51 }
 0x141   :  { %301 = vmatmul.mubr.bf16.vlgmr.msra.gmra.mrb[0].mxu0 %v90_v53  ;;  %2524 = vmatmul.mubr.bf16.vlgmr.msra.gmra.mrb[0].mxu1 %v90_v53 }
 0x142   :  { %2529 = vmatprep.mubr.msk.bf16.mxu0 %vm2839_vm0, %v2837_v4  ;;  %2535 = vmatprep.mubr.msk.bf16.mxu1 %vm2839_vm0, %v2837_v4 }
 0x214   :  { %v302_v61 = vpop.f32.mrb[0].mxu0  ;;  %v345_v63 = vpop.f32.mrb[0].mxu1 }
 0x215   :  { %v3041_v0 = vadd.f32 %v302_v61, %v128_v59  ;;  %v304_v3 = vpop.f32.mrb[1].mxu0  ;;  %v2525_v5 = vpop.f32.mrb[1].mxu1  ;;  %v346_v17 = vadd.f32 %v345_v63, %v136_v12 }
 0x216   :  { %v305_v6 = vadd.f32 %v304_v3, %v132_v60  ;;  %v306_v7 = vpop.f32.mrb[2].mxu0  ;;  %v348_v8 = vpop.f32.mrb[2].mxu1 }
 0x217   :  { %v3043_v9 = vadd.f32 %v306_v7, %v128_v59  ;;  %v308_v10 = vpop.f32.mrb[3].mxu0  ;;  %v2526_v11 = vpop.f32.mrb[3].mxu1  ;;  %v349_v20 = vadd.f32 %v348_v8, %v136_v12  ;;  %v3058_v22 = vpack.c.bf16 %v346_v17, %v346_v17  ;;  %v3092_v52 = vpack.c.bf16 %v3041_v0, %v3041_v0 }
 0x218   :  { %v3048_v13 = vpack.c.bf16 %v305_v6, %v3041_v0  ;;  %v309_v14 = vadd.f32 %v308_v10, %v132_v60 }
 0x219   :  { %v3061_v23 = vpack.c.bf16 %v349_v20, %v349_v20  ;;  %v500_v24 = vsel %vm498_vm2, %v3058_v22, 0  ;;  %v3098_v53 = vpack.c.bf16 %v3043_v9, %v3043_v9 }
 0x21a   :  { %v3051_v15 = vpack.c.bf16 %v309_v14, %v3043_v9  ;;  %v371_v16 = vrot.slane %v3048_v13, 4 }
 0x21b   :  { %v546_v25 = vsel %vm498_vm2, %v3061_v23, 0 }
 0x21c   :  { %v377_v18 = vsel %vm372_vm1, %v371_v16, 0  ;;  %v419_v19 = vrot.slane %v3051_v15, 4 }
 0x21d   :  { %2528 = vmatpush3.bf16.xpose.msra.mxu0 %v377_v18 }
 0x21e   :  { %v424_v21 = vsel %vm372_vm1, %v419_v19, 0  ;;  %2539 = vmatprep.subr.bf16.mxu0 %v2837_v4 }
 0x21f   :  { %2534 = vmatpush3.bf16.xpose.msra.mxu1 %v424_v21 }
 0x220   :  { %2545 = vmatprep.subr.bf16.mxu1 %v2837_v4 }
 0x224   :  { %2530 = vmatmul.mubr.msk.bf16.vlgmr.msra.gmra.mrb[4].mxu0 %vm372_vm1, %v3048_v13 }
 0x225   :  { %2540 = vmatpush3.bf16.msra.mxu0 %v500_v24  ;;  %2541 = vmatprep.mubr.msk.bf16.mxu0 %vm2839_vm0, %v2837_v4 }
 0x226   :  { %2536 = vmatmul.mubr.msk.bf16.vlgmr.msra.gmra.mrb[4].mxu1 %vm372_vm1, %v3051_v15  ;;  %2551 = vmatprep.subr.bf16.mxu0 %v2837_v4 }
 0x227   :  { %2546 = vmatpush3.bf16.msra.mxu1 %v546_v25  ;;  %2547 = vmatprep.mubr.msk.bf16.mxu1 %vm2839_vm0, %v2837_v4 }
 0x228   :  { %2557 = vmatprep.subr.bf16.mxu1 %v2837_v4 }
 0x2f7   :  { %v413_v27 = vpop.f32.mrb[4].mxu0 }
 0x2f8   :  { %v466_v28 = vmul.f32 0.17677669, %v413_v27  ;;  %v2531_v29 = vpop.f32.mrb[5].mxu0 }
 0x2f9   :  { %v416_v30 = vpop.f32.mrb[6].mxu0  ;;  %v460_v32 = vpop.f32.mrb[4].mxu1 }
 0x2fa   :  { %v467_v33 = vmul.f32 0.17677669, %v460_v32  ;;  %v2532_v34 = vpop.f32.mrb[7].mxu0  ;;  %v2537_v35 = vpop.f32.mrb[5].mxu1  ;;  %v468_v36 = vsel %vm370_vm3, %v466_v28, -1e+30 }
 0x2fb   :  { %v463_v37 = vpop.f32.mrb[6].mxu1  ;;  %v471_v38 = vsel %vm470_vm4, %v468_v36, -inf }
 0x2fc   :  { %v2538_v39 = vpop.f32.mrb[7].mxu1  ;;  %472 = vmax.xlane.f32.xlu0 %v471_v38  ;;  %v469_v40 = vsel %vm370_vm3, %v467_v33, -1e+30 }
 0x2fd   :  { %v474_v41 = vsel %vm470_vm4, %v469_v40, -inf }
 0x2fe   :  { %475 = vmax.xlane.f32.xlu1 %v474_v41 }
 0x30f   :  { %645 = vrot.lane.b32.xlu1 %v3051_v15, %s2840_s2 }
 0x389   :  { %v473_v42 = vpop.xlane.xlu0 %472 }
 0x38a   :  { %v477_v43 = vsub.f32 %v468_v36, %v473_v42 }
 0x38b   :  { %v476_v44 = vpop.xlane.xlu1 %475 }
 0x38c   :  { %v479_v45 = vmul.f32 1.442695, %v477_v43  ;;  %v478_v46 = vsub.f32 %v469_v40, %v476_v44 }
 0x38e   :  { %2785 = vpow2.f32 %v479_v45  ;;  %v481_v47 = vmul.f32 1.442695, %v478_v46 }
 0x38f   :  { %v646_v54 = vpop.permute.xlu1 %645 }
 0x390   :  { %2787 = vpow2.f32 %v481_v47  ;;  %v647_v5 = vrot.slane %v646_v54, 4 }
 0x392   :  { %v655_v10 = vsel %vm372_vm1, %v647_v5, 0  ;;  %v2695_v5 = vld [vmem:[%s3524_s5 + $0x10] sm:$0xff]  }
 0x398   :  { %v2786_v48 = vpop.eup %2785 }
 0x399   :  { %v483_v49 = vsel %vm470_vm4, %v2786_v48, 0.0 }
 0x39a   :  { %v2788_v50 = vpop.eup %2787  ;;  %484 = vadd.xlane.f32.xlu0 %v483_v49 }
 0x39b   :  { %v486_v51 = vsel %vm470_vm4, %v2788_v50, 0.0 }
 0x39c   :  { %487 = vadd.xlane.f32.xlu1 %v486_v51 }
 0x3ad   :  { %597 = vrot.lane.b32.xlu1 %v3092_v52, %s2840_s2 }
 0x3b0   :  { %593 = vrot.lane.b32.xlu0 %v3048_v13, %s2840_s2 }
 0x3b1   :  { %649 = vrot.lane.b32.xlu1 %v3098_v53, %s2840_s2 }
 0x427   :  { %v485_v57 = vpop.xlane.xlu0 %484 }
 0x428   :  { %2789 = vrcp.f32 %v485_v57 }
 0x429   :  { %v488_v59 = vpop.xlane.xlu1 %487 }
 0x42a   :  { %2791 = vrcp.f32 %v488_v59 }
 0x42b   :  { %v594_v60 = vpop.permute.xlu0 %593 }
 0x42c   :  { %v595_v0 = vrot.slane %v594_v60, 4 }
 0x42d   :  { %v598_v11 = vpop.permute.xlu1 %597 }
 0x42e   :  { %v603_v8 = vsel %vm372_vm1, %v595_v0, 0 }
 0x431   :  { %v650_v12 = vpop.permute.xlu1 %649 }
 0x432   :  { %v2790_v61 = vpop.eup %2789 }
 0x433   :  { %v491_v63 = vmul.f32 %v2790_v61, %v2786_v48 }
 0x434   :  { %v2792_v3 = vpop.eup %2791 }
 0x435   :  { %v492_v6 = vmul.f32 %v2792_v3, %v2788_v50  ;;  %v493_v7 = vpack.c.bf16 %v491_v63, %v491_v63 }
 0x437   :  { %2542 = vmatmul.mubr.msk.bf16.vlgmr.msra.gmra.mrb[8].mxu0 %vm470_vm4, %v493_v7  ;;  %v494_v9 = vpack.c.bf16 %v492_v6, %v492_v6 }
 0x438   :  { %2552 = vmatpush3.bf16.xpose.msra.mxu0 %v603_v8  ;;  %2553 = vmatprep.mubr.msk.bf16.mxu0 %vm2839_vm0, %v2837_v4 }
 0x439   :  { %2548 = vmatmul.mubr.msk.bf16.vlgmr.msra.gmra.mrb[8].mxu1 %vm470_vm4, %v494_v9  ;;  %2563 = vmatprep.subr.bf16.mxu0 %v2837_v4  ;;  %v2693_v9 = vld [vmem:[%s3524_s5] sm:$0xff]  }
 0x43a   :  { %2558 = vmatpush3.bf16.xpose.msra.mxu1 %v655_v10  ;;  %2559 = vmatprep.mubr.msk.bf16.mxu1 %vm2839_vm0, %v2837_v4 }
 0x43b   :  { %2569 = vmatprep.subr.bf16.mxu1 %v2837_v4 }
 0x43f   :  { %2554 = vmatmul.mubr.msk.bf16.vlgmr.msra.gmra.mrb[12].mxu0 %vm372_vm1, %v598_v11  ;;  %v2696_v11 = vld [vmem:[%s3524_s5 + $0x18] sm:$0xff]  }
 0x440   :  { %2565 = vmatprep.mubr.msk.bf16.mxu0 %vm2839_vm0, %v2837_v4 }
 0x441   :  { %2560 = vmatmul.mubr.msk.bf16.vlgmr.msra.gmra.mrb[12].mxu1 %vm372_vm1, %v650_v12 }
 0x442   :  { %2571 = vmatprep.mubr.msk.bf16.mxu1 %vm2839_vm0, %v2837_v4 }
 0x50a   :  { %v3120_v14 = vpop.f32.mrb[8].mxu0 }
 0x50b   :  { %v2543_v16 = vpop.f32.mrb[9].mxu0 }
 0x50c   :  { %v539_v17 = vpop.f32.mrb[10].mxu0  ;;  %v3122_v18 = vpop.f32.mrb[8].mxu1  ;;  %v2694_v16 = vld [vmem:[%s3524_s5 + $0x8] sm:$0xff]  }
 0x50d   :  { %v588_v19 = vpack.c.bf16 %v3122_v18, %v3120_v14  ;;  %v2544_v20 = vpop.f32.mrb[11].mxu0  ;;  %v2549_v21 = vpop.f32.mrb[9].mxu1 }
 0x50e   :  { %v585_v24 = vpop.f32.mrb[10].mxu1 }
 0x50f   :  { %v2550_v25 = vpop.f32.mrb[11].mxu1 }
 0x512   :  { %v639_v27 = vpop.f32.mrb[12].mxu0 }
 0x513   :  { %v697_v28 = vmul.f32 0.17677669, %v639_v27  ;;  %v2555_v29 = vpop.f32.mrb[13].mxu0 }
 0x514   :  { %v642_v30 = vpop.f32.mrb[14].mxu0  ;;  %v691_v32 = vpop.f32.mrb[12].mxu1 }
 0x515   :  { %v698_v33 = vmul.f32 0.17677669, %v691_v32  ;;  %v2556_v34 = vpop.f32.mrb[15].mxu0  ;;  %v2561_v35 = vpop.f32.mrb[13].mxu1  ;;  %v699_v36 = vsel %vm370_vm3, %v697_v28, -1e+30 }
 0x516   :  { %v694_v37 = vpop.f32.mrb[14].mxu1  ;;  %v701_v38 = vsel %vm470_vm4, %v699_v36, -inf }
 0x517   :  { %v2562_v39 = vpop.f32.mrb[15].mxu1  ;;  %702 = vmax.xlane.f32.xlu0 %v701_v38  ;;  %v700_v40 = vsel %vm370_vm3, %v698_v33, -1e+30 }
 0x518   :  { %v704_v41 = vsel %vm470_vm4, %v700_v40, -inf }
 0x519   :  { %705 = vmax.xlane.f32.xlu1 %v704_v41 }
 0x52a   :  { %773 = vrot.lane.b32.xlu1 %v3061_v23, %s2840_s2 }
 0x52e   :  { %938 = vrot.lane.b32.xlu1 %v3048_v13, %s2841_s4 }
 0x532   :  { %989 = vrot.lane.b32.xlu1 %v3051_v15, %s2841_s4 }
 0x536   :  { %992 = vrot.lane.b32.xlu1 %v3098_v53, %s2841_s4 }
 0x5a4   :  { %v703_v42 = vpop.xlane.xlu0 %702 }
 0x5a5   :  { %v707_v43 = vsub.f32 %v699_v36, %v703_v42 }
 0x5a6   :  { %v706_v44 = vpop.xlane.xlu1 %705 }
 0x5a7   :  { %v709_v45 = vmul.f32 1.442695, %v707_v43  ;;  %v708_v46 = vsub.f32 %v700_v40, %v706_v44 }
 0x5a9   :  { %2793 = vpow2.f32 %v709_v45  ;;  %v711_v47 = vmul.f32 1.442695, %v708_v46 }
 0x5aa   :  { %v774_v48 = vpop.permute.xlu1 %773 }
 0x5ab   :  { %2795 = vpow2.f32 %v711_v47  ;;  %v779_v49 = vsel %vm498_vm2, %v774_v48, 0 }
 0x5ac   :  { %2570 = vmatpush3.bf16.msra.mxu1 %v779_v49 }
 0x5ad   :  { %2583 = vmatprep.subr.bf16.mxu1 %v2837_v4 }
 0x5ae   :  { %v939_v12 = vpop.permute.xlu1 %938 }
 0x5af   :  { %v940_v18 = vrot.slane %v939_v12, 4 }
 0x5b1   :  { %v947_v33 = vsel %vm372_vm1, %v940_v18, 0 }
 0x5b2   :  { %v990_v17 = vpop.permute.xlu1 %989 }
 0x5b3   :  { %v2794_v50 = vpop.eup %2793  ;;  %v991_v20 = vrot.slane %v990_v17, 4 }
 0x5b4   :  { %v713_v51 = vsel %vm470_vm4, %v2794_v50, 0.0 }
 0x5b5   :  { %v2796_v54 = vpop.eup %2795  ;;  %714 = vadd.xlane.f32.xlu0 %v713_v51  ;;  %v998_v21 = vsel %vm372_vm1, %v991_v20, 0 }
 0x5b6   :  { %v716_v57 = vsel %vm470_vm4, %v2796_v54, 0.0  ;;  %v993_v24 = vpop.permute.xlu1 %992 }
 0x5b9   :  { %717 = vadd.xlane.f32.xlu0 %v716_v57 }
 0x5cf   :  { %725 = vrot.lane.b32.xlu0 %v3058_v22, %s2840_s2 }
 0x5d3   :  { %941 = vrot.lane.b32.xlu0 %v3092_v52, %s2841_s4 }
 0x642   :  { %v715_v59 = vpop.xlane.xlu0 %714 }
 0x643   :  { %2797 = vrcp.f32 %v715_v59 }
 0x646   :  { %v718_v60 = vpop.xlane.xlu0 %717 }
 0x647   :  { %2799 = vrcp.f32 %v718_v60 }
 0x64a   :  { %v726_v61 = vpop.permute.xlu0 %725 }
 0x64b   :  { %v731_v63 = vsel %vm498_vm2, %v726_v61, 0 }
 0x64c   :  { %2564 = vmatpush3.bf16.msra.mxu0 %v731_v63 }
 0x64d   :  { %v2798_v0 = vpop.eup %2797  ;;  %2575 = vmatprep.subr.bf16.mxu0 %v2837_v4 }
 0x64e   :  { %v721_v3 = vmul.f32 %v2798_v0, %v2794_v50  ;;  %v942_v37 = vpop.permute.xlu0 %941 }
 0x650   :  { %v723_v6 = vpack.c.bf16 %v721_v3, %v721_v3 }
 0x651   :  { %v2800_v7 = vpop.eup %2799 }
 0x652   :  { %v722_v8 = vmul.f32 %v2800_v7, %v2796_v54  ;;  %2566 = vmatmul.mubr.msk.bf16.vlgmr.msra.gmra.mrb[16].mxu0 %vm470_vm4, %v723_v6 }
 0x653   :  { %2576 = vmatpush3.bf16.msra.mxu0 %v2695_v5  ;;  %2579 = vmatprep.mubr.msk.bf16.mxu0 %vm2839_vm0, %v2837_v4 }
 0x654   :  { %v724_v10 = vpack.c.bf16 %v722_v8, %v722_v8  ;;  %2577 = vmatprep.subr.bf16.mxu0 %v2837_v4 }
 0x656   :  { %2572 = vmatmul.mubr.msk.bf16.vlgmr.msra.gmra.mrb[16].mxu1 %vm470_vm4, %v724_v10 }
 0x657   :  { %2584 = vmatpush3.bf16.msra.mxu1 %v2693_v9  ;;  %2587 = vmatprep.mubr.msk.bf16.mxu1 %vm2839_vm0, %v2837_v4 }
 0x658   :  { %2585 = vmatprep.subr.bf16.mxu1 %v2837_v4  ;;  %2578 = vmatpush3.bf16.msra.mxu0 %v2696_v11 }
 0x659   :  { %2591 = vmatprep.subr.bf16.mxu0 %v2837_v4 }
 0x65b   :  { %2586 = vmatpush3.bf16.msra.mxu1 %v2694_v16 }
 0x65c   :  { %2597 = vmatprep.subr.bf16.mxu1 %v2837_v4 }
 0x65e   :  { %2588 = vmatmul.mubr.msk.bf16.vlgmr.msra.gmra.mrb[20].mxu1 %vm372_vm1, %v588_v19 }
 0x65f   :  { %2599 = vmatprep.mubr.msk.bf16.mxu1 %vm2839_vm0, %v2837_v4 }
 0x664   :  { %2598 = vmatpush3.bf16.xpose.msra.mxu1 %v998_v21 }
 0x665   :  { %2609 = vmatprep.subr.bf16.mxu1 %v2837_v4 }
 0x66b   :  { %2600 = vmatmul.mubr.msk.bf16.vlgmr.msra.gmra.mrb[24].mxu1 %vm372_vm1, %v993_v24 }
 0x66c   :  { %2611 = vmatprep.mubr.msk.bf16.mxu1 %vm2839_vm0, %v2837_v4 }
 0x725   :  { %v767_v25 = vpop.f32.mrb[16].mxu0 }
 0x726   :  { %v2567_v27 = vpop.f32.mrb[17].mxu0 }
 0x727   :  { %v770_v14 = vpop.f32.mrb[18].mxu0 }
 0x728   :  { %v2568_v19 = vpop.f32.mrb[19].mxu0 }
 0x729   :  { %v815_v28 = vpop.f32.mrb[16].mxu1 }
 0x72a   :  { %v821_v29 = vpack.c.bf16 %v815_v28, %v767_v25  ;;  %v2573_v30 = vpop.f32.mrb[17].mxu1 }
 0x72b   :  { %v818_v32 = vpop.f32.mrb[18].mxu1 }
 0x72c   :  { %v2574_v34 = vpop.f32.mrb[19].mxu1  ;;  %2580 = vmatmul.mubr.msk.bf16.vlgmr.msra.gmra.mrb[20].mxu0 %vm372_vm1, %v821_v29 }
 0x72d   :  { %2592 = vmatpush3.bf16.xpose.msra.mxu0 %v947_v33  ;;  %2593 = vmatprep.mubr.msk.bf16.mxu0 %vm2839_vm0, %v2837_v4 }
 0x72e   :  { %2603 = vmatprep.subr.bf16.mxu0 %v2837_v4 }
 0x731   :  { %v931_v35 = vpop.f32.mrb[20].mxu1 }
 0x732   :  { %v2589_v36 = vpop.f32.mrb[21].mxu1 }
 0x733   :  { %v934_v38 = vpop.f32.mrb[22].mxu1 }
 0x734   :  { %v2590_v39 = vpop.f32.mrb[23].mxu1  ;;  %2594 = vmatmul.mubr.msk.bf16.vlgmr.msra.gmra.mrb[24].mxu0 %vm372_vm1, %v942_v37 }
 0x735   :  { %2605 = vmatprep.mubr.msk.bf16.mxu0 %vm2839_vm0, %v2837_v4 }
 0x73e   :  { %v1034_v40 = vpop.f32.mrb[24].mxu1 }
 0x73f   :  { %v1041_v41 = vmul.f32 0.17677669, %v1034_v40  ;;  %v2601_v42 = vpop.f32.mrb[25].mxu1 }
 0x740   :  { %v1037_v43 = vpop.f32.mrb[26].mxu1 }
 0x741   :  { %v2602_v44 = vpop.f32.mrb[27].mxu1  ;;  %v1043_v45 = vsel %vm370_vm3, %v1041_v41, -1e+30 }
 0x742   :  { %v1047_v46 = vsel %vm470_vm4, %v1043_v45, -inf }
 0x743   :  { %1048 = vmax.xlane.f32.xlu1 %v1047_v46 }
 0x754   :  { %1116 = vrot.lane.b32.xlu1 %v3061_v23, %s2841_s4 }
 0x758   :  { %1227 = vrot.lane.b32.xlu1 %v3048_v13, %s2842_s15 }
 0x75c   :  { %1278 = vrot.lane.b32.xlu1 %v3051_v15, %s2842_s15 }
 0x760   :  { %1281 = vrot.lane.b32.xlu1 %v3098_v53, %s2842_s15 }
 0x7d0   :  { %v1049_v47 = vpop.xlane.xlu1 %1048 }
 0x7d1   :  { %v1051_v50 = vsub.f32 %v1043_v45, %v1049_v47 }
 0x7d3   :  { %v1054_v51 = vmul.f32 1.442695, %v1051_v50 }
 0x7d4   :  { %v1117_v48 = vpop.permute.xlu1 %1116 }
 0x7d5   :  { %v1122_v49 = vsel %vm498_vm2, %v1117_v48, 0  ;;  %2801 = vpow2.f32 %v1054_v51 }
 0x7d6   :  { %2610 = vmatpush3.bf16.msra.mxu1 %v1122_v49 }
 0x7d7   :  { %2623 = vmatprep.subr.bf16.mxu1 %v2837_v4 }
 0x7d8   :  { %v1228_v16 = vpop.permute.xlu1 %1227 }
 0x7d9   :  { %v1229_v24 = vrot.slane %v1228_v16, 4 }
 0x7db   :  { %v1236_v14 = vsel %vm372_vm1, %v1229_v24, 0 }
 0x7dc   :  { %v1279_v43 = vpop.permute.xlu1 %1278 }
 0x7dd   :  { %v1280_v47 = vrot.slane %v1279_v43, 4 }
 0x7df   :  { %v2802_v7 = vpop.eup %2801 }
 0x7e0   :  { %v1059_v8 = vsel %vm470_vm4, %v2802_v7, 0.0 }
 0x7ff   :  { %v875_v54 = vpop.f32.mrb[20].mxu0 }
 0x800   :  { %v3204_v57 = vadd.f32 %v931_v35, %v875_v54  ;;  %v2581_v59 = vpop.f32.mrb[21].mxu0  ;;  %v1287_v54 = vsel %vm372_vm1, %v1280_v47, 0 }
 0x801   :  { %v878_v13 = vpop.f32.mrb[22].mxu0 }
 0x802   :  { %v3206_v60 = vadd.f32 %v934_v38, %v878_v13  ;;  %v2582_v15 = vpop.f32.mrb[23].mxu0  ;;  %v2698_v38 = vld [vmem:[%s3524_s5 + $0x28] sm:$0xff]   ;;  %v1282_v13 = vpop.permute.xlu1 %1281 }
 0x807   :  { %v983_v61 = vpop.f32.mrb[24].mxu0 }
 0x808   :  { %v1040_v53 = vmul.f32 0.17677669, %v983_v61  ;;  %v2595_v63 = vpop.f32.mrb[25].mxu0 }
 0x809   :  { %v986_v0 = vpop.f32.mrb[26].mxu0 }
 0x80a   :  { %v2596_v3 = vpop.f32.mrb[27].mxu0  ;;  %v1042_v5 = vsel %vm370_vm3, %v1040_v53, -1e+30 }
 0x80b   :  { %v1044_v6 = vsel %vm470_vm4, %v1042_v5, -inf }
 0x80c   :  { %1045 = vmax.xlane.f32.xlu0 %v1044_v6 }
 0x810   :  { %1060 = vadd.xlane.f32.xlu0 %v1059_v8 }
 0x899   :  { %v1046_v9 = vpop.xlane.xlu0 %1045 }
 0x89a   :  { %v1050_v10 = vsub.f32 %v1042_v5, %v1046_v9 }
 0x89c   :  { %v1052_v11 = vmul.f32 1.442695, %v1050_v10 }
 0x89d   :  { %v1061_v12 = vpop.xlane.xlu0 %1060 }
 0x89e   :  { %2803 = vpow2.f32 %v1052_v11 }
 0x89f   :  { %2805 = vrcp.f32 %v1061_v12 }
 0x8a8   :  { %v2804_v17 = vpop.eup %2803 }
 0x8a9   :  { %v2806_v20 = vpop.eup %2805  ;;  %v1056_v21 = vsel %vm470_vm4, %v2804_v17, 0.0 }
 0x8aa   :  { %v1065_v25 = vmul.f32 %v2806_v20, %v2802_v7  ;;  %1057 = vadd.xlane.f32.xlu0 %v1056_v21 }
 0x8ac   :  { %v1067_v27 = vpack.c.bf16 %v1065_v25, %v1065_v25 }
 0x8ae   :  { %2612 = vmatmul.mubr.msk.bf16.vlgmr.msra.gmra.mrb[28].mxu1 %vm470_vm4, %v1067_v27 }
 0x8af   :  { %2624 = vmatpush3.bf16.xpose.msra.mxu1 %v1236_v14  ;;  %2625 = vmatprep.mubr.msk.bf16.mxu1 %vm2839_vm0, %v2837_v4 }
 0x8b0   :  { %2635 = vmatprep.subr.bf16.mxu1 %v2837_v4 }
 0x8c0   :  { %1068 = vrot.lane.b32.xlu0 %v3058_v22, %s2841_s4 }
 0x8c4   :  { %1230 = vrot.lane.b32.xlu0 %v3092_v52, %s2842_s15  ;;  %v2697_v52 = vld [vmem:[%s3524_s5 + $0x20] sm:$0xff]  }
 0x937   :  { %v1058_v18 = vpop.xlane.xlu0 %1057 }
 0x938   :  { %2807 = vrcp.f32 %v1058_v18 }
 0x93b   :  { %v1069_v19 = vpop.permute.xlu0 %1068 }
 0x93c   :  { %v1074_v28 = vsel %vm498_vm2, %v1069_v19, 0 }
 0x93d   :  { %2604 = vmatpush3.bf16.msra.mxu0 %v1074_v28 }
 0x93e   :  { %2615 = vmatprep.subr.bf16.mxu0 %v2837_v4 }
 0x93f   :  { %v1231_v29 = vpop.permute.xlu0 %1230 }
 0x940   :  { %2626 = vmatmul.mubr.msk.bf16.vlgmr.msra.gmra.mrb[32].mxu1 %vm372_vm1, %v1231_v29 }
 0x941   :  { %2637 = vmatprep.mubr.msk.bf16.mxu1 %vm2839_vm0, %v2837_v4 }
 0x942   :  { %v2808_v30 = vpop.eup %2807 }
 0x943   :  { %v1064_v32 = vmul.f32 %v2808_v30, %v2804_v17 }
 0x945   :  { %v1066_v33 = vpack.c.bf16 %v1064_v32, %v1064_v32 }
 0x947   :  { %2606 = vmatmul.mubr.msk.bf16.vlgmr.msra.gmra.mrb[28].mxu0 %vm470_vm4, %v1066_v33 }
 0x948   :  { %2616 = vmatpush3.bf16.msra.mxu0 %v2697_v52  ;;  %2619 = vmatprep.mubr.msk.bf16.mxu0 %vm2839_vm0, %v2837_v4 }
 0x949   :  { %2617 = vmatprep.subr.bf16.mxu0 %v2837_v4 }
 0x94c   :  { %2618 = vmatpush3.bf16.msra.mxu0 %v2698_v38 }
 0x94d   :  { %2629 = vmatprep.subr.bf16.mxu0 %v2837_v4 }
 0x981   :  { %v1158_v34 = vpop.f32.mrb[28].mxu1 }
 0x982   :  { %v2613_v35 = vpop.f32.mrb[29].mxu1 }
 0x983   :  { %v1161_v36 = vpop.f32.mrb[30].mxu1  ;;  %v2700_v35 = vld [vmem:[%s3524_s5 + $0x38] sm:$0xff]  }
 0x984   :  { %v2614_v37 = vpop.f32.mrb[31].mxu1 }
 0xa13   :  { %v1272_v39 = vpop.f32.mrb[32].mxu1 }
 0xa14   :  { %v1329_v40 = vmul.f32 0.17677669, %v1272_v39  ;;  %v2627_v41 = vpop.f32.mrb[33].mxu1 }
 0xa15   :  { %v1275_v42 = vpop.f32.mrb[34].mxu1 }
 0xa16   :  { %v2628_v44 = vpop.f32.mrb[35].mxu1  ;;  %v1331_v45 = vsel %vm370_vm3, %v1329_v40, -1e+30 }
 0xa17   :  { %v1333_v46 = vsel %vm470_vm4, %v1331_v45, -inf }
 0xa18   :  { %1334 = vmax.xlane.f32.xlu0 %v1333_v46 }
 0xa1a   :  { %v1110_v48 = vpop.f32.mrb[28].mxu0 }
 0xa1b   :  { %v1164_v49 = vpack.c.bf16 %v1158_v34, %v1110_v48  ;;  %v2607_v50 = vpop.f32.mrb[29].mxu0  ;;  %v2699_v34 = vld [vmem:[%s3524_s5 + $0x30] sm:$0xff]   ;;  %v2327_v48 = vld [vmem:[%s3525_s6] ss:$0 sm:$0xff] }
 0xa1c   :  { %v1113_v51 = vpop.f32.mrb[30].mxu0 }
 0xa1d   :  { %v2608_v59 = vpop.f32.mrb[31].mxu0  ;;  %2620 = vmatmul.mubr.msk.bf16.vlgmr.msra.gmra.mrb[32].mxu0 %vm372_vm1, %v1164_v49 }
 0xa1e   :  { %2630 = vmatpush3.bf16.xpose.msra.mxu0 %v1287_v54  ;;  %2631 = vmatprep.mubr.msk.bf16.mxu0 %vm2839_vm0, %v2837_v4 }
 0xa1f   :  { %2641 = vmatprep.subr.bf16.mxu0 %v2837_v4 }
 0xa25   :  { %2632 = vmatmul.mubr.msk.bf16.vlgmr.msra.gmra.mrb[36].mxu0 %vm372_vm1, %v1282_v13  ;;  %v2701_v13 = vld [vmem:[%s3526_s9] ss:$16 sps:$4 sm:$0xff]  }
 0xa26   :  { %2643 = vmatprep.mubr.msk.bf16.mxu0 %vm2839_vm0, %v2837_v4 }
 0xaa5   :  { %v1335_v15 = vpop.xlane.xlu0 %1334 }
 0xaa6   :  { %v1339_v61 = vsub.f32 %v1331_v45, %v1335_v15  ;;  %v2706_v15 = vld [vmem:[%s3526_s9 + $0xc] ss:$16 sps:$4 sm:$0xff]  }
 0xaa8   :  { %v1341_v53 = vmul.f32 1.442695, %v1339_v61  ;;  %v2707_v61 = vld [vmem:[%s3526_s9 + $0x20] ss:$16 sps:$4 sm:$0xff]  }
 0xaaa   :  { %2809 = vpow2.f32 %v1341_v53  ;;  %v2709_v53 = vld [vmem:[%s3526_s9 + $0x24] ss:$16 sps:$4 sm:$0xff]  }
 0xab4   :  { %v2810_v63 = vpop.eup %2809 }
 0xab5   :  { %v1345_v0 = vsel %vm470_vm4, %v2810_v63, 0.0 }
 0xab6   :  { %1346 = vadd.xlane.f32.xlu0 %v1345_v0  ;;  %v2712_v0 = vld [vmem:[%s3526_s9 + $0x2c] ss:$16 sps:$4 sm:$0xff]  }
 0xaf0   :  { %v1218_v3 = vpop.f32.mrb[32].mxu0 }
 0xaf1   :  { %v1225_v5 = vadd.f32 %v1218_v3, %v3204_v57  ;;  %v2621_v6 = vpop.f32.mrb[33].mxu0 }
 0xaf2   :  { %v1221_v7 = vpop.f32.mrb[34].mxu0 }
 0xaf3   :  { %v3252_v8 = vadd.f32 %v1221_v7, %v3206_v60  ;;  %v2622_v9 = vpop.f32.mrb[35].mxu0 }
 0xaf8   :  { %v1323_v10 = vpop.f32.mrb[36].mxu0 }
 0xaf9   :  { %v1330_v11 = vmul.f32 0.17677669, %v1323_v10  ;;  %v2633_v12 = vpop.f32.mrb[37].mxu0 }
 0xafa   :  { %v1326_v16 = vpop.f32.mrb[38].mxu0  ;;  %v2715_v12 = vld [vmem:[%s3526_s9 + $0x44] ss:$16 sps:$4 sm:$0xff]  }
 0xafb   :  { %v2634_v17 = vpop.f32.mrb[39].mxu0  ;;  %v1332_v20 = vsel %vm370_vm3, %v1330_v11, -1e+30  ;;  %v2718_v16 = vld [vmem:[%s3526_s9 + $0x4c] ss:$16 sps:$4 sm:$0xff]  }
 0xafc   :  { %v1336_v21 = vsel %vm470_vm4, %v1332_v20, -inf  ;;  %v2713_v17 = vld [vmem:[%s3526_s9 + $0x40] ss:$16 sps:$4 sm:$0xff]  }
 0xafd   :  { %1337 = vmax.xlane.f32.xlu1 %v1336_v21  ;;  %v2721_v21 = vld [vmem:[%s3526_s9 + $0x64] ss:$16 sps:$4 sm:$0xff]  }
 0xb0e   :  { %1405 = vrot.lane.b32.xlu1 %v3061_v23, %s2842_s15 }
 0xb43   :  { %v1347_v26 = vpop.xlane.xlu0 %1346 }
 0xb8a   :  { %v1338_v57 = vpop.xlane.xlu1 %1337 }
 0xb8b   :  { %v1340_v24 = vsub.f32 %v1332_v20, %v1338_v57  ;;  %v2716_v20 = vld [vmem:[%s3526_s9 + $0x48] ss:$16 sps:$4 sm:$0xff]   ;;  %v2724_v57 = vld [vmem:[%s3526_s9 + $0x6c] ss:$16 sps:$4 sm:$0xff]  }
 0xb8d   :  { %v1343_v25 = vmul.f32 1.442695, %v1340_v24  ;;  %v2719_v24 = vld [vmem:[%s3526_s9 + $0x60] ss:$16 sps:$4 sm:$0xff]  }
 0xb8e   :  { %v1406_v60 = vpop.permute.xlu1 %1405 }
 0xb8f   :  { %2811 = vpow2.f32 %v1343_v25  ;;  %v1411_v27 = vsel %vm498_vm2, %v1406_v60, 0  ;;  %v2722_v25 = vld [vmem:[%s3526_s9 + $0x68] ss:$16 sps:$4 sm:$0xff]   ;;  %v2727_v60 = vld [vmem:[%s3526_s9 + $0x84] ss:$16 sps:$4 sm:$0xff]  }
 0xb90   :  { %2642 = vmatpush3.bf16.msra.mxu0 %v1411_v27  ;;  %2813 = vrcp.f32 %v1347_v26  ;;  %v2730_v27 = vld [vmem:[%s3526_s9 + $0x8c] ss:$16 sps:$4 sm:$0xff]   ;;  %v2733_v26 = vld [vmem:[%s3526_s9 + $0xa4] ss:$16 sps:$4 sm:$0xff]  }
 0xb99   :  { %v2812_v14 = vpop.eup %2811 }
 0xb9a   :  { %v1348_v18 = vsel %vm470_vm4, %v2812_v14, 0.0  ;;  %v2814_v19 = vpop.eup %2813 }
 0xb9b   :  { %1349 = vadd.xlane.f32.xlu0 %v1348_v18  ;;  %v1353_v23 = vmul.f32 %v2814_v19, %v2810_v63  ;;  %v2710_v63 = vld [vmem:[%s3526_s9 + $0x28] ss:$16 sps:$4 sm:$0xff]   ;;  %v2736_v19 = vld [vmem:[%s3526_s9 + $0xac] ss:$16 sps:$4 sm:$0xff]  }
 0xb9c   :  { %v2728_v18 = vld [vmem:[%s3526_s9 + $0x88] ss:$16 sps:$4 sm:$0xff]  }
 0xb9d   :  { %v1355_v32 = vpack.c.bf16 %v1353_v23, %v1353_v23  ;;  %v2734_v23 = vld [vmem:[%s3526_s9 + $0xa8] ss:$16 sps:$4 sm:$0xff]  }
 0xbb1   :  { %1357 = vrot.lane.b32.xlu0 %v3058_v22, %s2842_s15 }
 0xc28   :  { %v1350_v28 = vpop.xlane.xlu0 %1349 }
 0xc29   :  { %2815 = vrcp.f32 %v1350_v28  ;;  %v2731_v28 = vld [vmem:[%s3526_s9 + $0xa0] ss:$16 sps:$4 sm:$0xff]  }
 0xc2c   :  { %v1358_v29 = vpop.permute.xlu0 %1357 }
 0xc2d   :  { %v1363_v30 = vsel %vm498_vm2, %v1358_v29, 0  ;;  %v2737_v29 = vld [vmem:[%s3526_s9 + $0xc0] ss:$16 sps:$4 sm:$0xff]  }
 0xc2e   :  { %2636 = vmatpush3.bf16.msra.mxu1 %v1363_v30  ;;  %v2739_v30 = vld [vmem:[%s3526_s9 + $0xc4] ss:$16 sps:$4 sm:$0xff]  }
 0xc2f   :  { %2647 = vmatprep.subr.bf16.mxu1 %v2837_v4 }
 0xc31   :  { %2638 = vmatmul.mubr.msk.bf16.vlgmr.msra.gmra.mrb[36].mxu1 %vm470_vm4, %v1355_v32  ;;  %v2740_v32 = vld [vmem:[%s3526_s9 + $0xc8] ss:$16 sps:$4 sm:$0xff]  }
 0xc32   :  { %2651 = vmatprep.mubr.msk.bf16.mxu1 %vm2839_vm0, %v2837_v4  ;;  %2648 = vmatpush3.bf16.msra.mxu1 %v2699_v34  ;;  %v2743_v34 = vld [vmem:[%s3526_s9 + $0xe0] ss:$16 sps:$4 sm:$0xff]  }
 0xc33   :  { %v2816_v52 = vpop.eup %2815  ;;  %2649 = vmatprep.subr.bf16.mxu1 %v2837_v4 }
 0xc34   :  { %v1354_v22 = vmul.f32 %v2816_v52, %v2812_v14  ;;  %v2725_v14 = vld [vmem:[%s3526_s9 + $0x80] ss:$16 sps:$4 sm:$0xff]   ;;  %v2742_v52 = vld [vmem:[%s3526_s9 + $0xcc] ss:$16 sps:$4 sm:$0xff]  }
 0xc36   :  { %v1356_v33 = vpack.c.bf16 %v1354_v22, %v1354_v22  ;;  %2650 = vmatpush3.bf16.msra.mxu1 %v2700_v35  ;;  %v2745_v22 = vld [vmem:[%s3526_s9 + $0xe4] ss:$16 sps:$4 sm:$0xff]   ;;  %v2746_v35 = vld [vmem:[%s3526_s9 + $0xe8] ss:$16 sps:$4 sm:$0xff]  }
 0xc37   :  { %1825 = vmatprep.subr.bf16.mxu1 %v2706_v15  ;;  %v2753_v15 = vld [vmem:[%s3527_s11 + $0x48] sm:$0xff]  }
 0xc38   :  { %2644 = vmatmul.mubr.msk.bf16.vlgmr.msra.gmra.mrb[40].mxu0 %vm470_vm4, %v1356_v33  ;;  %v2748_v33 = vld [vmem:[%s3526_s9 + $0xec] ss:$16 sps:$4 sm:$0xff]  }
 0xc39   :  { %1814 = vmatprep.mubr.bf16.mxu0 %v2838_v31 }
 0xd04   :  { %v1399_v36 = vpop.f32.mrb[36].mxu1 }
 0xd05   :  { %v2639_v37 = vpop.f32.mrb[37].mxu1 }
 0xd06   :  { %v1402_v38 = vpop.f32.mrb[38].mxu1  ;;  %v2750_v37 = vld [vmem:[%s3527_s11 + $0xc0] sm:$0xff]  }
 0xd07   :  { %v2640_v39 = vpop.f32.mrb[39].mxu1 }
 0xd0b   :  { %v1447_v40 = vpop.f32.mrb[40].mxu0 }
 0xd0c   :  { %v1453_v41 = vpack.c.bf16 %v1447_v40, %v1399_v36  ;;  %v2645_v42 = vpop.f32.mrb[41].mxu0  ;;  %v2749_v36 = vld [vmem:[%s3527_s11 + $0x40] sm:$0xff]  }
 0xd0d   :  { %v1450_v43 = vpop.f32.mrb[42].mxu0 }
 0xd0e   :  { %v2646_v44 = vpop.f32.mrb[43].mxu0  ;;  %2652 = vmatmul.mubr.msk.bf16.vlgmr.msra.gmra.mrb[40].mxu1 %vm372_vm1, %v1453_v41 }
 0xd0f   :  { %1857 = vmatprep.mubr.bf16.mxu1 %v2838_v31 }
 0xde1   :  { %v1507_v45 = vpop.f32.mrb[40].mxu1 }
 0xde2   :  { %v1514_v4 = vadd.f32 %v1507_v45, %v1225_v5  ;;  %v2653_v46 = vpop.f32.mrb[41].mxu1  ;;  %v2328_v45 = vld [vmem:[%s3528_s7] ss:$0 sm:$0xff] }
 0xde3   :  { %v1510_v47 = vpop.f32.mrb[42].mxu1 }
 0xde4   :  { %v1516_v49 = vadd.f32 %v2916_v1, %v1514_v4  ;;  %v1515_v50 = vadd.f32 %v1510_v47, %v3252_v8  ;;  %v2654_v51 = vpop.f32.mrb[43].mxu1  ;;  %v2703_v1 = vld [vmem:[%s3526_s9 + $0x4] ss:$16 sps:$4 sm:$0xff]  }
 0xde5   :  { %1782 = vmatprep.subr.bf16.mxu0 %v2703_v1  ;;  %v2752_v1 = vld [vmem:[%s3527_s11 + $0x80] sm:$0xff]  }
 0xde6   :  { %v1517_v54 = vadd.f32 %v2919_v2, %v1515_v50  ;;  %v3285_v59 = vadd.f32 %v2327_v48, %v1516_v49  ;;  %v2704_v2 = vld [vmem:[%s3526_s9 + $0x8] ss:$16 sps:$4 sm:$0xff]   ;;  %1783 = vmatpush1.bf16.msra.mxu0 %v2701_v13  ;;  %v2329_v49 = vld [vmem:[%s3529_s8] ss:$0 sm:$0xff] }
 0xde7   :  { %1826 = vmatpush1.bf16.msra.mxu1 %v2704_v2  ;;  %1784 = vmatprep.subr.bf16.mxu0 %v2709_v53  ;;  %v2751_v13 = vld [vmem:[%s3527_s11] sm:$0xff]   ;;  %v2755_v53 = vld [vmem:[%s3527_s11 + $0x8] sm:$0xff]  }
 0xde8   :  { %1529 = vadd.xlane.f32.xlu1 %v3285_v59  ;;  %v3288_v31 = vadd.f32 %v2327_v48, %v1517_v54  ;;  %1827 = vmatprep.subr.bf16.mxu1 %v2712_v0  ;;  %v2757_v0 = vld [vmem:[%s3527_s11 + $0x50] sm:$0xff]  }
 0xdea   :  { %1531 = vadd.xlane.f32.xlu0 %v3288_v31  ;;  %1785 = vmatpush1.bf16.msra.mxu0 %v2707_v61  ;;  %v2754_v61 = vld [vmem:[%s3527_s11 + $0xc8] sm:$0xff]  }
 0xdeb   :  { %1828 = vmatpush1.bf16.msra.mxu1 %v2710_v63  ;;  %1786 = vmatprep.subr.bf16.mxu0 %v2715_v12  ;;  %v2756_v63 = vld [vmem:[%s3527_s11 + $0x88] sm:$0xff]   ;;  %v2766_v12 = vld [vmem:[%s3527_s11 + $0xe0] sm:$0xff]  }
 0xdec   :  { %1829 = vmatprep.subr.bf16.mxu1 %v2718_v16  ;;  %v2767_v16 = vld [vmem:[%s3527_s11 + $0x20] sm:$0xff]  }
 0xdee   :  { %1787 = vmatpush1.bf16.msra.mxu0 %v2713_v17  ;;  %v2768_v17 = vld [vmem:[%s3527_s11 + $0xa0] sm:$0xff]  }
 0xdef   :  { %1830 = vmatpush1.bf16.msra.mxu1 %v2716_v20  ;;  %1788 = vmatprep.subr.bf16.mxu0 %v2721_v21  ;;  %v2769_v20 = vld [vmem:[%s3527_s11 + $0x68] sm:$0xff]  }
 0xdf0   :  { %1831 = vmatprep.subr.bf16.mxu1 %v2724_v57  ;;  %v2770_v21 = vld [vmem:[%s3527_s11 + $0xe8] sm:$0xff]  }
 0xdf1   :  { %v2771_v57 = vld [vmem:[%s3527_s11 + $0x28] sm:$0xff]  }
 0xdf2   :  { %1789 = vmatpush1.bf16.msra.mxu0 %v2719_v24  ;;  %v2772_v24 = vld [vmem:[%s3527_s11 + $0xa8] sm:$0xff]  }
 0xdf3   :  { %1832 = vmatpush1.bf16.msra.mxu1 %v2722_v25  ;;  %1790 = vmatprep.subr.bf16.mxu0 %v2727_v60  ;;  %v2773_v25 = vld [vmem:[%s3527_s11 + $0x70] sm:$0xff]  }
 0xdf4   :  { %1833 = vmatprep.subr.bf16.mxu1 %v2730_v27  ;;  %v2774_v60 = vld [vmem:[%s3527_s11 + $0xf0] sm:$0xff]  }
 0xdf5   :  { %v2775_v27 = vld [vmem:[%s3527_s11 + $0x30] sm:$0xff]  }
 0xdf6   :  { %1791 = vmatpush1.bf16.msra.mxu0 %v2725_v14  ;;  %v2776_v14 = vld [vmem:[%s3527_s11 + $0xb0] sm:$0xff]  }
 0xdf7   :  { %1834 = vmatpush1.bf16.msra.mxu1 %v2728_v18  ;;  %1792 = vmatprep.subr.bf16.mxu0 %v2733_v26  ;;  %v2777_v18 = vld [vmem:[%s3527_s11 + $0x78] sm:$0xff]  }
 0xdf8   :  { %1835 = vmatprep.subr.bf16.mxu1 %v2736_v19  ;;  %v2778_v26 = vld [vmem:[%s3527_s11 + $0xf8] sm:$0xff]  }
 0xdf9   :  { %v2779_v19 = vld [vmem:[%s3527_s11 + $0x38] sm:$0xff]  }
 0xdfa   :  { %1793 = vmatpush1.bf16.msra.mxu0 %v2731_v28  ;;  %v2780_v28 = vld [vmem:[%s3527_s11 + $0xb8] sm:$0xff]  }
 0xdfb   :  { %1836 = vmatpush1.bf16.msra.mxu1 %v2734_v23  ;;  %1794 = vmatprep.subr.bf16.mxu0 %v2739_v30  ;;  %v1600_v23 = vld [vmem:[%s3530_s10] sm:$0xf] }
 0xdfc   :  { %1837 = vmatprep.subr.bf16.mxu1 %v2742_v52  ;;  %v1605_v30 = vrot.slane %v1600_v23, %v127_v56  ;;  %v1609_v52 = vrot.slane %v1600_v23, %v131_v58 }
 0xdfe   :  { %1795 = vmatpush1.bf16.msra.mxu0 %v2737_v29  ;;  %v1616_v29 = vsub.s32 3, %v3029_v55 }
 0xdff   :  { %1838 = vmatpush1.bf16.msra.mxu1 %v2740_v32  ;;  %1796 = vmatprep.subr.bf16.mxu0 %v2745_v22  ;;  %v1613_v32 = vrot.slane %v1600_v23, %v135_v62 }
 0xe00   :  { %1839 = vmatprep.subr.bf16.mxu1 %v2748_v33  ;;  %v1617_v22 = vrot.slane %v1600_v23, %v1616_v29 }
 0xe02   :  { %1797 = vmatpush1.bf16.msra.mxu0 %v2743_v34 }
 0xe03   :  { %1840 = vmatpush1.bf16.msra.mxu1 %v2746_v35  ;;  %2463 = vmatprep.subr.bf16.mxu0 %v2749_v36 }
 0xe04   :  { %2485 = vmatprep.subr.bf16.mxu1 %v2750_v37 }
 0xe75   :  { %v1530_v3 = vpop.xlane.xlu1 %1529 }
 0xe76   :  { %v1533_v5 = vmul.f32 0.0078125, %v1530_v3  ;;  %v2758_v3 = vld [vmem:[%s3527_s11 + $0xd0] sm:$0xff]  }
 0xe77   :  { %v1532_v6 = vpop.xlane.xlu0 %1531 }
 0xe78   :  { %v3316_v7 = vsub.f32 %v3285_v59, %v1533_v5  ;;  %v1534_v8 = vmul.f32 0.0078125, %v1532_v6  ;;  %v2759_v5 = vld [vmem:[%s3527_s11 + $0x10] sm:$0xff]  }
 0xe79   :  { %v2760_v6 = vld [vmem:[%s3527_s11 + $0x90] sm:$0xff]  }
 0xe7a   :  { %v3319_v9 = vsub.f32 %v3288_v31, %v1534_v8  ;;  %v1537_v10 = vmul.f32 %v3316_v7, %v3316_v7  ;;  %v2762_v8 = vld [vmem:[%s3527_s11 + $0xd8] sm:$0xff]  }
 0xe7c   :  { %1539 = vadd.xlane.f32.xlu0 %v1537_v10  ;;  %v1538_v11 = vmul.f32 %v3319_v9, %v3319_v9  ;;  %v2764_v10 = vld [vmem:[%s3527_s11 + $0x98] sm:$0xff]  }
 0xe7e   :  { %1541 = vadd.xlane.f32.xlu1 %v1538_v11  ;;  %v2765_v11 = vld [vmem:[%s3527_s11 + $0x60] sm:$0xff]  }
 0xf09   :  { %v1540_v38 = vpop.xlane.xlu0 %1539 }
 0xf0a   :  { %v1543_v39 = vmul.f32 0.0078125, %v1540_v38 }
 0xf0b   :  { %v1542_v40 = vpop.xlane.xlu1 %1541 }
 0xf0c   :  { %v1545_v41 = vadd.f32 1e-06, %v1543_v39  ;;  %v1544_v42 = vmul.f32 0.0078125, %v1542_v40 }
 0xf0e   :  { %2817 = vrsqrt.f32 %v1545_v41  ;;  %v1546_v43 = vadd.f32 1e-06, %v1544_v42 }
 0xf10   :  { %2819 = vrsqrt.f32 %v1546_v43 }
 0xf18   :  { %v2818_v44 = vpop.eup %2817 }
 0xf19   :  { %v1549_v4 = vmul.f32 %v2818_v44, %v3316_v7  ;;  %v2761_v7 = vld [vmem:[%s3527_s11 + $0x58] sm:$0xff]  }
 0xf1a   :  { %v2820_v46 = vpop.eup %2819 }
 0xf1b   :  { %v1550_v47 = vmul.f32 %v2820_v46, %v3319_v9  ;;  %v1557_v48 = vmul.f32 %v2328_v45, %v1549_v4  ;;  %v2763_v9 = vld [vmem:[%s3527_s11 + $0x18] sm:$0xff]  }
 0xf1d   :  { %v1558_v50 = vmul.f32 %v2328_v45, %v1550_v47  ;;  %v1565_v51 = vadd.f32 %v2329_v49, %v1557_v48 }
 0xf1f   :  { %v1566_v54 = vadd.f32 %v2329_v49, %v1558_v50 }
 0xf21   :  { %v1567_v2 = vpack.c.bf16 %v1566_v54, %v1565_v51 }
 0xf23   :  { %1815 = vmatmul.mubr.bf16.vlgmr.msra.gmra.mrb[44].mxu0 %v1567_v2  ;;  %1858 = vmatmul.mubr.bf16.vlgmr.msra.gmra.mrb[44].mxu1 %v1567_v2 }
 0xf24   :  { %2464 = vmatpush3.bf16.msra.mxu0 %v2751_v13  ;;  %2486 = vmatpush3.bf16.msra.mxu1 %v2752_v1 }
 0xf25   :  { %2465 = vmatprep.subr.bf16.mxu0 %v2753_v15  ;;  %2487 = vmatprep.subr.bf16.mxu1 %v2754_v61 }
 0xf28   :  { %2466 = vmatpush3.bf16.msra.mxu0 %v2755_v53  ;;  %2488 = vmatpush3.bf16.msra.mxu1 %v2756_v63 }
 0xf29   :  { %2467 = vmatprep.subr.bf16.mxu0 %v2757_v0  ;;  %2489 = vmatprep.subr.bf16.mxu1 %v2758_v3 }
 0xf2c   :  { %2468 = vmatpush3.bf16.msra.mxu0 %v2759_v5  ;;  %2490 = vmatpush3.bf16.msra.mxu1 %v2760_v6 }
 0xf2d   :  { %2469 = vmatprep.subr.bf16.mxu0 %v2761_v7  ;;  %2491 = vmatprep.subr.bf16.mxu1 %v2762_v8 }
 0xf30   :  { %2470 = vmatpush3.bf16.msra.mxu0 %v2763_v9  ;;  %2492 = vmatpush3.bf16.msra.mxu1 %v2764_v10 }
 0xf31   :  { %2471 = vmatprep.subr.bf16.mxu0 %v2765_v11  ;;  %2493 = vmatprep.subr.bf16.mxu1 %v2766_v12 }
 0xf34   :  { %2472 = vmatpush3.bf16.msra.mxu0 %v2767_v16  ;;  %2494 = vmatpush3.bf16.msra.mxu1 %v2768_v17 }
 0xf35   :  { %2473 = vmatprep.subr.bf16.mxu0 %v2769_v20  ;;  %2495 = vmatprep.subr.bf16.mxu1 %v2770_v21 }
 0xf38   :  { %2474 = vmatpush3.bf16.msra.mxu0 %v2771_v57  ;;  %2496 = vmatpush3.bf16.msra.mxu1 %v2772_v24 }
 0xf39   :  { %2475 = vmatprep.subr.bf16.mxu0 %v2773_v25  ;;  %2497 = vmatprep.subr.bf16.mxu1 %v2774_v60 }
 0xf3c   :  { %2476 = vmatpush3.bf16.msra.mxu0 %v2775_v27  ;;  %2498 = vmatpush3.bf16.msra.mxu1 %v2776_v14 }
 0xf3d   :  { %2477 = vmatprep.subr.bf16.mxu0 %v2777_v18  ;;  %2499 = vmatprep.subr.bf16.mxu1 %v2778_v26 }
 0xf40   :  { %2478 = vmatpush3.bf16.msra.mxu0 %v2779_v19  ;;  %2500 = vmatpush3.bf16.msra.mxu1 %v2780_v28 }
 0xff6   :  { %v1816_v33 = vpop.f32.mrb[44].mxu0  ;;  %v1859_v34 = vpop.f32.mrb[44].mxu1 }
 0xff7   :  { %v1817_v35 = vadd.f32 %v1816_v33, %v1605_v30  ;;  %v1860_v36 = vadd.f32 %v1859_v34, %v1613_v32  ;;  %v1818_v37 = vpop.f32.mrb[45].mxu0  ;;  %v1861_v38 = vpop.f32.mrb[45].mxu1  ;;  %v2362_v33 = vld [vmem:[%s3531_s12] ss:$0 sm:$0xff] }
 0xff8   :  { %v1819_v39 = vadd.f32 %v1818_v37, %v1609_v52  ;;  %v1862_v40 = vadd.f32 %v1861_v38, %v1617_v22  ;;  %v1820_v41 = vpop.f32.mrb[46].mxu0  ;;  %v1863_v42 = vpop.f32.mrb[46].mxu1 }
 0xff9   :  { %v1876_v43 = vmul.f32 0.70710677, %v1817_v35  ;;  %v1878_v44 = vmul.f32 0.70710677, %v1860_v36  ;;  %v1821_v62 = vadd.f32 %v1820_v41, %v1605_v30  ;;  %v1864_v4 = vadd.f32 %v1863_v42, %v1613_v32  ;;  %v1822_v55 = vpop.f32.mrb[47].mxu0  ;;  %v1865_v58 = vpop.f32.mrb[47].mxu1 }
 0xffa   :  { %v1877_v56 = vmul.f32 0.70710677, %v1819_v39  ;;  %v1879_v45 = vmul.f32 0.70710677, %v1862_v40  ;;  %v1823_v46 = vadd.f32 %v1822_v55, %v1609_v52  ;;  %v1866_v47 = vadd.f32 %v1865_v58, %v1617_v22 }
 0xffb   :  { %2821 = verf.f32 %v1876_v43  ;;  %v1880_v48 = vmul.f32 0.70710677, %v1821_v62  ;;  %v1882_v49 = vmul.f32 0.70710677, %v1864_v4  ;;  %v1868_v53 = vmul.f32 0.5, %v1817_v35 }
 0xffc   :  { %2823 = verf.f32 %v1878_v44  ;;  %v1881_v50 = vmul.f32 0.70710677, %v1823_v46  ;;  %v1883_v51 = vmul.f32 0.70710677, %v1866_v47  ;;  %v1870_v63 = vmul.f32 0.5, %v1860_v36 }
 0xffd   :  { %2825 = verf.f32 %v1877_v56  ;;  %v1869_v5 = vmul.f32 0.5, %v1819_v39  ;;  %v1872_v7 = vmul.f32 0.5, %v1821_v62  ;;  %v1871_v10 = vmul.f32 0.5, %v1862_v40 }
 0xffe   :  { %2827 = verf.f32 %v1879_v45  ;;  %v1874_v12 = vmul.f32 0.5, %v1864_v4  ;;  %v1873_v57 = vmul.f32 0.5, %v1823_v46  ;;  %v1875_v27 = vmul.f32 0.5, %v1866_v47 }
 0xfff   :  { %2829 = verf.f32 %v1880_v48 }
0x1000   :  { %2831 = verf.f32 %v1882_v49 }
0x1001   :  { %2833 = verf.f32 %v1881_v50 }
0x1002   :  { %2835 = verf.f32 %v1883_v51 }
0x1005   :  { %v2822_v54 = vpop.eup %2821 }
0x1006   :  { %v2824_v13 = vpop.eup %2823  ;;  %v1892_v15 = vadd.f32 1.0, %v2822_v54 }
0x1007   :  { %v2826_v1 = vpop.eup %2825  ;;  %v1894_v0 = vadd.f32 1.0, %v2824_v13 }
0x1008   :  { %v2828_v2 = vpop.eup %2827  ;;  %v1893_v6 = vadd.f32 1.0, %v2826_v1  ;;  %v1900_v20 = vmul.f32 %v1892_v15, %v1868_v53 }
0x1009   :  { %v2830_v61 = vpop.eup %2829  ;;  %v1895_v11 = vadd.f32 1.0, %v2828_v2  ;;  %v1902_v25 = vmul.f32 %v1894_v0, %v1870_v63 }
0x100a   :  { %v2832_v3 = vpop.eup %2831  ;;  %v1896_v8 = vadd.f32 1.0, %v2830_v61  ;;  %v1901_v18 = vmul.f32 %v1893_v6, %v1869_v5 }
0x100b   :  { %v2834_v9 = vpop.eup %2833  ;;  %v1898_v16 = vadd.f32 1.0, %v2832_v3  ;;  %v1903_v28 = vmul.f32 %v1895_v11, %v1871_v10 }
0x100c   :  { %v2836_v17 = vpop.eup %2835  ;;  %v1904_v21 = vmul.f32 %v1896_v8, %v1872_v7  ;;  %v1897_v24 = vadd.f32 1.0, %v2834_v9 }
0x100d   :  { %v1906_v60 = vmul.f32 %v1898_v16, %v1874_v12  ;;  %v1899_v14 = vadd.f32 1.0, %v2836_v17 }
0x100e   :  { %v1908_v26 = vpack.c.bf16 %v1904_v21, %v1900_v20  ;;  %v1905_v19 = vmul.f32 %v1897_v24, %v1873_v57 }
0x100f   :  { %v1910_v23 = vpack.c.bf16 %v1906_v60, %v1902_v25  ;;  %v1907_v29 = vmul.f32 %v1899_v14, %v1875_v27 }
0x1010   :  { %v1909_v30 = vpack.c.bf16 %v1905_v19, %v1901_v18 }
0x1011   :  { %v1911_v32 = vpack.c.bf16 %v1907_v29, %v1903_v28 }
0x1012   :  { %2207 = vmatprep.mubr.bf16.mxu0 %v1909_v30 }
0x1013   :  { %2248 = vmatprep.mubr.bf16.mxu1 %v1911_v32  ;;  %2208 = vmatmul.mubr.bf16.vlgmr.msra.gmra.mrb[48].mxu0 %v1908_v26 }
0x1014   :  { %2249 = vmatmul.mubr.bf16.vlgmr.msra.gmra.mrb[48].mxu1 %v1910_v23 }
0x10e6   :  { %v2479_v52 = vpop.f32.mrb[48].mxu0 }
0x10e7   :  { %v2501_v22 = vpop.f32.mrb[48].mxu1  ;;  %v2480_v34 = vpop.f32.mrb[49].mxu0 }
0x10e8   :  { %v2481_v35 = vadd.f32 %v2480_v34, %v2479_v52  ;;  %v2502_v36 = vpop.f32.mrb[49].mxu1  ;;  %v2482_v37 = vpop.f32.mrb[50].mxu0 }
0x10e9   :  { %v2503_v38 = vadd.f32 %v2502_v36, %v2501_v22  ;;  %v2504_v39 = vpop.f32.mrb[50].mxu1  ;;  %v2483_v40 = vpop.f32.mrb[51].mxu0 }
0x10ea   :  { %v2210_v41 = vadd.f32 %v2481_v35, %v2362_v33  ;;  %v2484_v42 = vadd.f32 %v2483_v40, %v2482_v37  ;;  %v2505_v43 = vpop.f32.mrb[51].mxu1 }
0x10eb   :  { %v2506_v44 = vadd.f32 %v2505_v43, %v2504_v39 }
0x10ec   :  { %v2251_v56 = vadd.f32 %v2503_v38, %v2210_v41  ;;  %v2213_v45 = vadd.f32 %v2484_v42, %v2362_v33 }
0x10ee   :  { %v2254_v62 = vadd.f32 %v2506_v44, %v2213_v45  ;;  %v2257_v4 = vadd.f32 %v2251_v56, %v3285_v59 }
0x10f0   :  { %v2258_v55 = vadd.f32 %v2254_v62, %v3288_v31 }
0x10f2   :  { %v2408_v58 = vpack.c.bf16 %v2258_v55, %v2257_v4 }
0x10f4   :  { %2409 = vst [vmem:[%s3532_s13] sm:$0xff] %v2408_v58  }

</bundles_post_ra>
